<compile_context>
chip_gen: v7x
topology: tpu7x:2x2x1
jax: 0.10.0
libtpu: 0.0.40
codegen_flags: <defaults>
</compile_context>

<pallas_src>
import jax
import jax.numpy as jnp
from jax import lax
from jax.experimental import pallas as pl
from jax.experimental.pallas import tpu as pltpu


def _vmem_capacity_bytes():
    """Physical VMEM of the local TPU; conservative (v7x) default on failure."""
    try:
        info = pltpu.get_tpu_info()
        cap = int(getattr(info, "vmem_capacity_bytes", 0) or 0)
        if cap > 0:
            return cap
    except Exception:
        pass
    return 64 * 2 ** 20


def _footprint_bytes(t_tile, halo, D, K, H, act_bytes, single_buffer_w):
    """Rough per-step VMEM footprint used to size the time tile."""
    R = t_tile + 2 * halo
    xin = 2 * R * D * act_bytes                    # double-buffered x tile + halos
    xout = 2 * t_tile * D * act_bytes              # double-buffered output tile
    w_elems = D * 2 * D + 2 * D + D * K * H + K * H + H * D + 3 * D
    wbuf = w_elems * 4 * (1 if single_buffer_w else 2)
    interm = (7 * R + 4 * t_tile) * D * 4          # f32 temporaries (generous)
    return xin + xout + wbuf + interm


def _pick_t_tile(B, T, halo, row_mult, D, K, H, act_bytes, budget, single_buffer_w):
    cap = max(row_mult, min(512, (T // row_mult) * row_mult))
    if B == 1 and T > row_mult:
        # keep at least 2 time tiles so both v7x TensorCores get work
        half = max(row_mult, (((T + 1) // 2) + row_mult - 1) // row_mult * row_mult)
        cap = min(cap, half)
    t = cap
    while t > row_mult and _footprint_bytes(t, halo, D, K, H, act_bytes,
                                            single_buffer_w) > budget:
        t -= row_mult
    return t


def _make_kernel(*, seq_len, t_tile, halo, kernel_size, num_heads, dim,
                 use_ln, res, eps=1e-5):
    K = kernel_size
    H = num_heads
    pad = K // 2
    R = t_tile + 2 * halo  # rows processed per step (tile + both halos)

    def kernel(x_top_ref, x_cur_ref, x_bot_ref,
               gamma_ref, beta_ref,
               wk_ref, bk_ref, wc_ref, bc_ref,
               expand_ref, bias_ref,
               o_ref):
        i = pl.program_id(1)
        cdt = wk_ref.dtype                                            # MXU operand dtype

        x_cur = x_cur_ref[...]                                        # (TT, D)
        x_ext = jnp.concatenate(
            [x_top_ref[...], x_cur, x_bot_ref[...]], axis=0)          # (R, D)

        # ---- LayerNorm (f32 statistics, output in MXU operand dtype) ----
        if use_ln:
            xf = x_ext.astype(jnp.float32)
            mu = jnp.mean(xf, axis=1, keepdims=True)
            var = jnp.mean(jnp.square(xf - mu), axis=1, keepdims=True)
            h = (xf - mu) * lax.rsqrt(var + eps)
            h = h * gamma_ref[...] + beta_ref[...]
            h = h.astype(cdt)
        else:
            h = x_ext.astype(cdt)

        # ---- fused k_layer: one (R, D) @ (D, 2D) MXU matmul, then GLU ----
        proj = (jnp.dot(h, wk_ref[...], preferred_element_type=jnp.float32)
                + bk_ref[...])                                        # (R, 2D) f32
        a = proj[:, :dim]
        g = proj[:, dim:]
        k = a * pl.reciprocal(1.0 + jnp.exp(-g), approx=True)        # GLU (EUP recip)

        # ---- zero rows outside [0, seq_len) (halo clamp / partial tile) --
        row = lax.broadcasted_iota(jnp.int32, (R, 1), 0)
        g_row = i * t_tile - halo + row
        k = jnp.where((g_row >= 0) & (g_row < seq_len), k, 0.0)      # (R, D) f32

        k_cur = k[halo:halo + t_tile]                                 # (TT, D) aligned

        # ---- fused per-tap kernel logits: one (TT,D)@(D,K*H) matmul ------
        logits = (jnp.dot(k_cur.astype(cdt), wc_ref[...],
                          preferred_element_type=jnp.float32)
                  + bc_ref[...])                                      # (TT, K*H) f32
        taps = [logits[:, j * H:(j + 1) * H] for j in range(K)]      # tap-major slices
        m = taps[0]
        for j in range(1, K):
            m = jnp.maximum(m, taps[j])
        exps = [jnp.exp(t - m) for t in taps]
        denom = exps[0]
        for j in range(1, K):
            denom = denom + exps[j]
        inv = pl.reciprocal(denom, approx=True)                       # (TT, H), EUP

        # ---- dynamic depthwise conv over time (tap shifts on the XLU) ----
        expand = expand_ref[...]                                      # (H, D) one-hot
        acc = jnp.zeros((t_tile, dim), jnp.float32)
        for j in range(K):
            wmap = jnp.dot((exps[j] * inv).astype(cdt), expand,
                           preferred_element_type=jnp.float32)        # (TT, D)
            if j == pad:
                tap = k_cur
            else:
                tap = pltpu.roll(k, shift=(pad - j) % R,
                                 axis=0)[halo:halo + t_tile]
            acc = acc + wmap * tap

        out = acc + bias_ref[...]
        if res:
            out = out + x_cur.astype(jnp.float32)
        o_ref[...] = out.astype(o_ref.dtype)

    return kernel


def dynamic_conv(x, gamma, beta, w_k, b_k, w_c, b_c, conv_bias,
                 *, kernel_size=3, num_heads=8, use_ln=True, res=True,
                 t_tile=None):
    """Fused DynamicConv forward.

    x:         (B, T, D)
    gamma/beta:(D,)           LayerNorm params
    w_k, b_k:  (2D, D), (2D,) k_layer (PyTorch Linear layout: (out, in))
    w_c, b_c:  (K*H, D),(K*H,) conv_kernel_layer
    conv_bias: (D,)           LightConv bias
    """
    B, T, D = x.shape
    K, H = kernel_size, num_heads
    pad = K // 2
    assert K % 2 == 1, "odd kernel_size required (same as the PyTorch module)"
    assert D % H == 0
    hs = D // H

    act_bytes = x.dtype.itemsize
    # sublane granularity of the packed activation dtype (f32:8, bf16:16, int8:32)
    row_mult = 8 if act_bytes >= 4 else (16 if act_bytes == 2 else 32)
    halo = row_mult
    assert pad <= halo, "kernel_size too large for the halo"
    assert T >= row_mult, "sequence length too short for this tiling"

    # --- host-side weight repacking (lane-friendly, fused-matmul layouts) ----
    w_dtype = jnp.bfloat16 if x.dtype == jnp.bfloat16 else jnp.float32
    w_k = jnp.asarray(w_k, jnp.float32)
    w_c = jnp.asarray(w_c, jnp.float32)
    wk_p = w_k.T.astype(w_dtype)                                    # (D, 2D) fused GLU
    bk_p = jnp.asarray(b_k, jnp.float32).reshape(1, 2 * D)
    wc_p = (w_c.reshape(H, K, D).transpose(1, 0, 2)                 # tap-major columns
            .reshape(K * H, D).T.astype(w_dtype))                   # (D, K*H)
    bc_p = jnp.asarray(b_c, jnp.float32).reshape(H, K).T.reshape(1, K * H)
    expand = (jnp.arange(D)[None, :] // hs ==
              jnp.arange(H)[:, None]).astype(w_dtype)               # (H, D) head->chan
    gamma_p = jnp.asarray(gamma, jnp.float32).reshape(1, D)
    beta_p = jnp.asarray(beta, jnp.float32).reshape(1, D)
    bias_p = jnp.asarray(conv_bias, jnp.float32).reshape(1, D)

    # --- per-generation VMEM budget (v7x: 64 MiB phys, v5e/v6e: 128 MiB) -----
    phys_vmem = _vmem_capacity_bytes()
    vmem_limit = max(32 * 2 ** 20, min(int(phys_vmem * 0.8), 100 * 2 ** 20))
    budget = int(vmem_limit * 0.85)

    def run(single_buffer_weights):
        if t_tile is not None:
            tt = t_tile
            assert tt % row_mult == 0
        else:
            tt = _pick_t_tile(B, T, halo, row_mult, D, K, H, act_bytes,
                              budget, single_buffer_weights)
        n_t = -(-T // tt)                       # cdiv: last tile may be partial (masked)
        n_halo = -(-T // halo)
        tpb = tt // halo

        kernel = _make_kernel(seq_len=T, t_tile=tt, halo=halo, kernel_size=K,
                              num_heads=H, dim=D, use_ln=use_ln, res=res)

        def top_map(b, i):
            return (b, jnp.maximum(i * tpb - 1, 0), 0)

        def bot_map(b, i):
            return (b, jnp.minimum((i + 1) * tpb, n_halo - 1), 0)

        wkw = {}
        if single_buffer_weights:
            # constant index_map -> one resident copy is enough; halves weight VMEM
            wkw = dict(pipeline_mode=pl.Buffered(1))

        grid_spec = pltpu.PrefetchScalarGridSpec(
            num_scalar_prefetch=0,
            grid=(B, n_t),
            in_specs=[
                pl.BlockSpec((pl.Squeezed(), halo, D), top_map),                 # x top halo
                pl.BlockSpec((pl.Squeezed(), tt, D), lambda b, i: (b, i, 0)),    # x tile
                pl.BlockSpec((pl.Squeezed(), halo, D), bot_map),                 # x bottom halo
                pl.BlockSpec((1, D), lambda b, i: (0, 0), **wkw),                # gamma
                pl.BlockSpec((1, D), lambda b, i: (0, 0), **wkw),                # beta
                pl.BlockSpec((D, 2 * D), lambda b, i: (0, 0), **wkw),            # w_k fused
                pl.BlockSpec((1, 2 * D), lambda b, i: (0, 0), **wkw),            # b_k fused
                pl.BlockSpec((D, K * H), lambda b, i: (0, 0), **wkw),            # w_c tap-major
                pl.BlockSpec((1, K * H), lambda b, i: (0, 0), **wkw),            # b_c tap-major
                pl.BlockSpec((H, D), lambda b, i: (0, 0), **wkw),                # head->chan
                pl.BlockSpec((1, D), lambda b, i: (0, 0), **wkw),                # lconv bias
            ],
            out_specs=pl.BlockSpec((pl.Squeezed(), tt, D), lambda b, i: (b, i, 0)),
        )

        return pl.pallas_call(
            kernel,
            out_shape=jax.ShapeDtypeStruct((B, T, D), x.dtype),
            grid_spec=grid_spec,
            compiler_params=pltpu.CompilerParams(
                dimension_semantics=("parallel", "parallel"),
                vmem_limit_bytes=vmem_limit,
            ),
        )(x, x, x, gamma_p, beta_p, wk_p, bk_p, wc_p, bc_p, expand, bias_p)

    try:
        return run(True)
    except Exception:
        # pl.Buffered(1) not supported by this JAX build -> default double-buffering.
        return run(False)


def _reference(x, gamma, beta, w_k, b_k, w_c, b_c, conv_bias,
               *, kernel_size=3, num_heads=8, use_ln=True, res=True, eps=1e-5):
    """Pure-JAX mirror of DynamicConv.forward / LightConv.forward."""
    HI = jax.lax.Precision.HIGHEST
    B, T, D = x.shape
    K, H = kernel_size, num_heads
    hs = D // H
    pad = K // 2

    h = x
    if use_ln:
        mu = jnp.mean(h, axis=-1, keepdims=True)
        var = jnp.mean(jnp.square(h - mu), axis=-1, keepdims=True)
        h = (h - mu) / jnp.sqrt(var + eps) * gamma + beta
    proj = jnp.dot(h, w_k.T, precision=HI) + b_k
    a, g = proj[..., :D], proj[..., D:]
    k = a * jax.nn.sigmoid(g)                                   # GLU

    wl = (jnp.dot(k, w_c.T, precision=HI) + b_c).reshape(B, T, H, K)
    w = jax.nn.softmax(wl, axis=-1)

    kp = jnp.pad(k, ((0, 0), (pad, pad), (0, 0)))
    taps = jnp.stack([kp[:, j:j + T, :] for j in range(K)], axis=2)   # (B,T,K,D)
    taps = taps.reshape(B, T, K, H, hs)
    out = jnp.einsum('btkhd,bthk->bthd', taps, w, precision=HI).reshape(B, T, D)
    out = out + conv_bias
    if res:
        out = out + x
    return out


if __name__ == "__main__":
    key = jax.random.PRNGKey(0)
    ks = jax.random.split(key, 8)

    B, T, D = 2, 16, 32          # dim_in == dim_out == 32 (required by LN + residual)
    K, H = 3, 8

    x = jax.random.normal(ks[0], (B, T, D), dtype=jnp.float32)
    gamma = 1.0 + 0.1 * jax.random.normal(ks[1], (D,), dtype=jnp.float32)
    beta = 0.1 * jax.random.normal(ks[2], (D,), dtype=jnp.float32)
    w_k = jax.random.normal(ks[3], (2 * D, D), dtype=jnp.float32) / jnp.sqrt(D)
    b_k = 0.1 * jax.random.normal(ks[4], (2 * D,), dtype=jnp.float32)
    w_c = jax.random.normal(ks[5], (K * H, D), dtype=jnp.float32) / jnp.sqrt(D)
    b_c = 0.1 * jax.random.normal(ks[6], (K * H,), dtype=jnp.float32)
    conv_bias = 0.1 * jax.random.normal(ks[7], (D,), dtype=jnp.float32)

    out = dynamic_conv(x, gamma, beta, w_k, b_k, w_c, b_c, conv_bias,
                       kernel_size=K, num_heads=H)
    out = jax.block_until_ready(out)

    ref = _reference(x, gamma, beta, w_k, b_k, w_c, b_c, conv_bias,
                     kernel_size=K, num_heads=H)
    assert out.shape == (B, T, D)
    # tolerance covers MXU contraction precision + approx (EUP) reciprocals
    assert jnp.allclose(out, ref, atol=5e-3, rtol=5e-3), (
        "f32 mismatch vs reference, max abs diff = "
        + str(float(jnp.max(jnp.abs(out - ref)))))

    # bf16 activation path (bf16 MXU operands / bf16 weights, f32 accumulation)
    xb = x.astype(jnp.bfloat16)
    out_b = dynamic_conv(xb, gamma, beta, w_k, b_k, w_c, b_c, conv_bias,
                         kernel_size=K, num_heads=H)
    out_b = jax.block_until_ready(out_b)
    ref_b = _reference(xb.astype(jnp.float32), gamma, beta, w_k, b_k, w_c, b_c,
                       conv_bias, kernel_size=K, num_heads=H)
    assert jnp.allclose(out_b.astype(jnp.float32), ref_b, atol=1e-1, rtol=1e-1), (
        "bf16 mismatch vs reference, max abs diff = "
        + str(float(jnp.max(jnp.abs(out_b.astype(jnp.float32) - ref_b)))))

    print("KERNEL_OK")
</pallas_src>

<mosaic_0001>
module attributes {stable_mosaic.version = 11 : i64} {
  func.func @kernel(%arg0: i32, %arg1: i32, %arg2: memref<1x8x32xf32, #tpu.memory_space<vmem>>, %arg3: memref<1x16x32xf32, #tpu.memory_space<vmem>>, %arg4: memref<1x8x32xf32, #tpu.memory_space<vmem>>, %arg5: memref<1x32xf32, #tpu.memory_space<vmem>>, %arg6: memref<1x32xf32, #tpu.memory_space<vmem>>, %arg7: memref<32x64xf32, #tpu.memory_space<vmem>>, %arg8: memref<1x64xf32, #tpu.memory_space<vmem>>, %arg9: memref<32x24xf32, #tpu.memory_space<vmem>>, %arg10: memref<1x24xf32, #tpu.memory_space<vmem>>, %arg11: memref<8x32xf32, #tpu.memory_space<vmem>>, %arg12: memref<1x32xf32, #tpu.memory_space<vmem>>, %arg13: memref<1x16x32xf32, #tpu.memory_space<vmem>>) attributes {dimension_semantics = [#tpu.dimension_semantics<parallel>, #tpu.dimension_semantics<parallel>], iteration_bounds = array<i64: 2, 1>, scalar_prefetch = 0 : i64, scratch_operands = 0 : i64, tpu.core_type = #tpu.core_type<tc>, window_params = [{transform_indices = @transform_0, window_bounds = array<i64: 1, 8, 32>}, {transform_indices = @transform_1, window_bounds = array<i64: 1, 16, 32>}, {transform_indices = @transform_2, window_bounds = array<i64: 1, 8, 32>}, {pipeline_mode = #tpu.pipeline_mode<synchronous>, transform_indices = @transform_3, window_bounds = array<i64: 1, 32>}, {pipeline_mode = #tpu.pipeline_mode<synchronous>, transform_indices = @transform_4, window_bounds = array<i64: 1, 32>}, {pipeline_mode = #tpu.pipeline_mode<synchronous>, transform_indices = @transform_5, window_bounds = array<i64: 32, 64>}, {pipeline_mode = #tpu.pipeline_mode<synchronous>, transform_indices = @transform_6, window_bounds = array<i64: 1, 64>}, {pipeline_mode = #tpu.pipeline_mode<synchronous>, transform_indices = @transform_7, window_bounds = array<i64: 32, 24>}, {pipeline_mode = #tpu.pipeline_mode<synchronous>, transform_indices = @transform_8, window_bounds = array<i64: 1, 24>}, {pipeline_mode = #tpu.pipeline_mode<synchronous>, transform_indices = @transform_9, window_bounds = array<i64: 8, 32>}, {pipeline_mode = #tpu.pipeline_mode<synchronous>, transform_indices = @transform_10, window_bounds = array<i64: 1, 32>}, {transform_indices = @transform_11, window_bounds = array<i64: 1, 16, 32>}]} {
    %c0 = arith.constant 0 : index
    %c0_0 = arith.constant 0 : index
    %c0_1 = arith.constant 0 : index
    %0 = vector.load %arg3[%c0, %c0_0, %c0_1] : memref<1x16x32xf32, #tpu.memory_space<vmem>>, vector<1x16x32xf32>
    %1 = vector.shape_cast %0 : vector<1x16x32xf32> to vector<16x32xf32>
    %c0_2 = arith.constant 0 : index
    %c0_3 = arith.constant 0 : index
    %c0_4 = arith.constant 0 : index
    %2 = vector.load %arg2[%c0_2, %c0_3, %c0_4] : memref<1x8x32xf32, #tpu.memory_space<vmem>>, vector<1x8x32xf32>
    %3 = vector.shape_cast %2 : vector<1x8x32xf32> to vector<8x32xf32>
    %c0_5 = arith.constant 0 : index
    %c0_6 = arith.constant 0 : index
    %c0_7 = arith.constant 0 : index
    %4 = vector.load %arg4[%c0_5, %c0_6, %c0_7] : memref<1x8x32xf32, #tpu.memory_space<vmem>>, vector<1x8x32xf32>
    %5 = vector.shape_cast %4 : vector<1x8x32xf32> to vector<8x32xf32>
    %6 = tpu.concatenate %3, %1, %5 in 0 : vector<8x32xf32>, vector<16x32xf32>, vector<8x32xf32> -> vector<32x32xf32>
    %cst = arith.constant dense<0.000000e+00> : vector<32xf32>
    %7 = vector.multi_reduction <add>, %6, %cst [1] : vector<32x32xf32> to vector<32xf32>
    %8 = vector.shape_cast %7 : vector<32xf32> to vector<32x1xf32>
    %cst_8 = arith.constant 3.200000e+01 : f32
    %9 = vector.broadcast %cst_8 : f32 to vector<32x1xf32>
    %10 = arith.divf %8, %9 : vector<32x1xf32>
    %11 = vector.broadcast %10 : vector<32x1xf32> to vector<32x32xf32>
    %12 = arith.subf %6, %11 : vector<32x32xf32>
    %13 = arith.mulf %12, %12 : vector<32x32xf32>
    %cst_9 = arith.constant dense<0.000000e+00> : vector<32xf32>
    %14 = vector.multi_reduction <add>, %13, %cst_9 [1] : vector<32x32xf32> to vector<32xf32>
    %15 = vector.shape_cast %14 : vector<32xf32> to vector<32x1xf32>
    %cst_10 = arith.constant 3.200000e+01 : f32
    %16 = vector.broadcast %cst_10 : f32 to vector<32x1xf32>
    %17 = arith.divf %15, %16 : vector<32x1xf32>
    %18 = vector.broadcast %10 : vector<32x1xf32> to vector<32x32xf32>
    %19 = arith.subf %6, %18 : vector<32x32xf32>
    %cst_11 = arith.constant 9.99999974E-6 : f32
    %20 = vector.broadcast %cst_11 : f32 to vector<32x1xf32>
    %21 = arith.addf %17, %20 : vector<32x1xf32>
    %22 = math.rsqrt %21 : vector<32x1xf32>
    %23 = vector.broadcast %22 : vector<32x1xf32> to vector<32x32xf32>
    %24 = arith.mulf %19, %23 : vector<32x32xf32>
    %c0_12 = arith.constant 0 : index
    %c0_13 = arith.constant 0 : index
    %25 = vector.load %arg5[%c0_12, %c0_13] : memref<1x32xf32, #tpu.memory_space<vmem>>, vector<1x32xf32>
    %26 = vector.broadcast %25 : vector<1x32xf32> to vector<32x32xf32>
    %27 = arith.mulf %24, %26 : vector<32x32xf32>
    %c0_14 = arith.constant 0 : index
    %c0_15 = arith.constant 0 : index
    %28 = vector.load %arg6[%c0_14, %c0_15] : memref<1x32xf32, #tpu.memory_space<vmem>>, vector<1x32xf32>
    %29 = vector.broadcast %28 : vector<1x32xf32> to vector<32x32xf32>
    %30 = arith.addf %27, %29 : vector<32x32xf32>
    %c0_16 = arith.constant 0 : index
    %c0_17 = arith.constant 0 : index
    %31 = vector.load %arg7[%c0_16, %c0_17] : memref<32x64xf32, #tpu.memory_space<vmem>>, vector<32x64xf32>
    %cst_18 = arith.constant dense<0.000000e+00> : vector<32x64xf32>
    %32 = tpu.matmul %30, %31, %cst_18 {dimension_numbers = #tpu.dot_dimension_numbers<[1], [0], [0], [1], [0, 0, 1, 1], [], []>} : vector<32x32xf32>, vector<32x64xf32>, vector<32x64xf32> -> vector<32x64xf32>
    %c0_19 = arith.constant 0 : index
    %c0_20 = arith.constant 0 : index
    %33 = vector.load %arg8[%c0_19, %c0_20] : memref<1x64xf32, #tpu.memory_space<vmem>>, vector<1x64xf32>
    %34 = vector.broadcast %33 : vector<1x64xf32> to vector<32x64xf32>
    %35 = arith.addf %32, %34 : vector<32x64xf32>
    %36 = vector.extract_strided_slice %35 {offsets = [0, 0], sizes = [32, 32], strides = [1, 1]} : vector<32x64xf32> to vector<32x32xf32>
    %37 = vector.extract_strided_slice %35 {offsets = [0, 32], sizes = [32, 32], strides = [1, 1]} : vector<32x64xf32> to vector<32x32xf32>
    %cst_21 = arith.constant 0.000000e+00 : f32
    %38 = vector.broadcast %cst_21 : f32 to vector<32x32xf32>
    %39 = arith.subf %38, %37 : vector<32x32xf32>
    %40 = math.exp %39 : vector<32x32xf32>
    %cst_22 = arith.constant 1.000000e+00 : f32
    %41 = vector.broadcast %cst_22 : f32 to vector<32x32xf32>
    %42 = arith.addf %41, %40 : vector<32x32xf32>
    %43 = tpu.reciprocal %42 {approx = true} : vector<32x32xf32> -> vector<32x32xf32>
    %44 = arith.mulf %36, %43 : vector<32x32xf32>
    %45 = tpu.iota {dimensions = array<i32: 0>} : vector<32x1xi32>
    %c16_i32 = arith.constant 16 : i32
    %46 = arith.muli %arg1, %c16_i32 : i32
    %c8_i32 = arith.constant 8 : i32
    %47 = arith.subi %46, %c8_i32 : i32
    %48 = vector.broadcast %47 : i32 to vector<32x1xi32>
    %49 = arith.addi %48, %45 : vector<32x1xi32>
    %c0_i32 = arith.constant 0 : i32
    %50 = vector.broadcast %c0_i32 : i32 to vector<32x1xi32>
    %51 = arith.cmpi sge, %49, %50 : vector<32x1xi32>
    %c16_i32_23 = arith.constant 16 : i32
    %52 = vector.broadcast %c16_i32_23 : i32 to vector<32x1xi32>
    %53 = arith.cmpi slt, %49, %52 : vector<32x1xi32>
    %54 = arith.andi %51, %53 : vector<32x1xi1>
    %cst_24 = arith.constant 0.000000e+00 : f32
    %55 = vector.shape_cast %54 : vector<32x1xi1> to vector<32x1xi1>
    %56 = vector.broadcast %55 : vector<32x1xi1> to vector<32x32xi1>
    %57 = vector.broadcast %cst_24 : f32 to vector<32x32xf32>
    %58 = arith.select %56, %44, %57 : vector<32x32xi1>, vector<32x32xf32>
    %59 = vector.extract_strided_slice %58 {offsets = [8, 0], sizes = [16, 32], strides = [1, 1]} : vector<32x32xf32> to vector<16x32xf32>
    %c0_25 = arith.constant 0 : index
    %c0_26 = arith.constant 0 : index
    %60 = vector.load %arg9[%c0_25, %c0_26] : memref<32x24xf32, #tpu.memory_space<vmem>>, vector<32x24xf32>
    %cst_27 = arith.constant dense<0.000000e+00> : vector<16x24xf32>
    %61 = tpu.matmul %59, %60, %cst_27 {dimension_numbers = #tpu.dot_dimension_numbers<[1], [0], [0], [1], [0, 0, 1, 1], [], []>} : vector<16x32xf32>, vector<32x24xf32>, vector<16x24xf32> -> vector<16x24xf32>
    %c0_28 = arith.constant 0 : index
    %c0_29 = arith.constant 0 : index
    %62 = vector.load %arg10[%c0_28, %c0_29] : memref<1x24xf32, #tpu.memory_space<vmem>>, vector<1x24xf32>
    %63 = vector.broadcast %62 : vector<1x24xf32> to vector<16x24xf32>
    %64 = arith.addf %61, %63 : vector<16x24xf32>
    %65 = vector.extract_strided_slice %64 {offsets = [0, 0], sizes = [16, 8], strides = [1, 1]} : vector<16x24xf32> to vector<16x8xf32>
    %66 = vector.extract_strided_slice %64 {offsets = [0, 8], sizes = [16, 8], strides = [1, 1]} : vector<16x24xf32> to vector<16x8xf32>
    %67 = vector.extract_strided_slice %64 {offsets = [0, 16], sizes = [16, 8], strides = [1, 1]} : vector<16x24xf32> to vector<16x8xf32>
    %68 = arith.maximumf %65, %66 : vector<16x8xf32>
    %69 = arith.maximumf %68, %67 : vector<16x8xf32>
    %70 = arith.subf %65, %69 : vector<16x8xf32>
    %71 = math.exp %70 : vector<16x8xf32>
    %72 = arith.subf %66, %69 : vector<16x8xf32>
    %73 = math.exp %72 : vector<16x8xf32>
    %74 = arith.subf %67, %69 : vector<16x8xf32>
    %75 = math.exp %74 : vector<16x8xf32>
    %76 = arith.addf %71, %73 : vector<16x8xf32>
    %77 = arith.addf %76, %75 : vector<16x8xf32>
    %78 = tpu.reciprocal %77 {approx = true} : vector<16x8xf32> -> vector<16x8xf32>
    %c0_30 = arith.constant 0 : index
    %c0_31 = arith.constant 0 : index
    %79 = vector.load %arg11[%c0_30, %c0_31] : memref<8x32xf32, #tpu.memory_space<vmem>>, vector<8x32xf32>
    %cst_32 = arith.constant 0.000000e+00 : f32
    %80 = vector.broadcast %cst_32 : f32 to vector<16x32xf32>
    %81 = arith.mulf %71, %78 : vector<16x8xf32>
    %cst_33 = arith.constant dense<0.000000e+00> : vector<16x32xf32>
    %82 = tpu.matmul %81, %79, %cst_33 {dimension_numbers = #tpu.dot_dimension_numbers<[1], [0], [0], [1], [0, 0, 1, 1], [], []>} : vector<16x8xf32>, vector<8x32xf32>, vector<16x32xf32> -> vector<16x32xf32>
    %c1_i32 = arith.constant 1 : i32
    %83 = tpu.dynamic_rotate %58 by %c1_i32 dim 0 : vector<32x32xf32>, i32 -> vector<32x32xf32>
    %84 = vector.extract_strided_slice %83 {offsets = [8, 0], sizes = [16, 32], strides = [1, 1]} : vector<32x32xf32> to vector<16x32xf32>
    %85 = arith.mulf %82, %84 : vector<16x32xf32>
    %86 = arith.addf %80, %85 : vector<16x32xf32>
    %87 = arith.mulf %73, %78 : vector<16x8xf32>
    %cst_34 = arith.constant dense<0.000000e+00> : vector<16x32xf32>
    %88 = tpu.matmul %87, %79, %cst_34 {dimension_numbers = #tpu.dot_dimension_numbers<[1], [0], [0], [1], [0, 0, 1, 1], [], []>} : vector<16x8xf32>, vector<8x32xf32>, vector<16x32xf32> -> vector<16x32xf32>
    %89 = arith.mulf %88, %59 : vector<16x32xf32>
    %90 = arith.addf %86, %89 : vector<16x32xf32>
    %91 = arith.mulf %75, %78 : vector<16x8xf32>
    %cst_35 = arith.constant dense<0.000000e+00> : vector<16x32xf32>
    %92 = tpu.matmul %91, %79, %cst_35 {dimension_numbers = #tpu.dot_dimension_numbers<[1], [0], [0], [1], [0, 0, 1, 1], [], []>} : vector<16x8xf32>, vector<8x32xf32>, vector<16x32xf32> -> vector<16x32xf32>
    %c31_i32 = arith.constant 31 : i32
    %93 = tpu.dynamic_rotate %58 by %c31_i32 dim 0 : vector<32x32xf32>, i32 -> vector<32x32xf32>
    %94 = vector.extract_strided_slice %93 {offsets = [8, 0], sizes = [16, 32], strides = [1, 1]} : vector<32x32xf32> to vector<16x32xf32>
    %95 = arith.mulf %92, %94 : vector<16x32xf32>
    %96 = arith.addf %90, %95 : vector<16x32xf32>
    %c0_36 = arith.constant 0 : index
    %c0_37 = arith.constant 0 : index
    %97 = vector.load %arg12[%c0_36, %c0_37] : memref<1x32xf32, #tpu.memory_space<vmem>>, vector<1x32xf32>
    %98 = vector.broadcast %97 : vector<1x32xf32> to vector<16x32xf32>
    %99 = arith.addf %96, %98 : vector<16x32xf32>
    %100 = arith.addf %99, %1 : vector<16x32xf32>
    %c0_38 = arith.constant 0 : index
    %c0_39 = arith.constant 0 : index
    %c0_40 = arith.constant 0 : index
    %101 = vector.load %arg13[%c0_38, %c0_39, %c0_40] : memref<1x16x32xf32, #tpu.memory_space<vmem>>, vector<1x16x32xf32>
    %102 = vector.shape_cast %101 : vector<1x16x32xf32> to vector<16x32xf32>
    %103 = vector.shape_cast %100 : vector<16x32xf32> to vector<1x16x32xf32>
    tpu.vector_store %arg13[%c0_38, %c0_39, %c0_40], %103 {strides = array<i32>} : memref<1x16x32xf32, #tpu.memory_space<vmem>>, vector<1x16x32xf32>,
    return
  }
  func.func @transform_0(%arg0: i32, %arg1: i32) -> (i32, i32, i32) {
    %c2_i32 = arith.constant 2 : i32
    %0 = arith.muli %arg1, %c2_i32 : i32
    %c1_i32 = arith.constant 1 : i32
    %1 = arith.subi %0, %c1_i32 : i32
    %c0_i32 = arith.constant 0 : i32
    %2 = arith.maxsi %1, %c0_i32 : i32
    %c0_i32_0 = arith.constant 0 : i32
    %c0_i32_1 = arith.constant 0 : i32
    return %arg0, %2, %c0_i32_0 : i32, i32, i32
  }
  func.func @transform_1(%arg0: i32, %arg1: i32) -> (i32, i32, i32) {
    %c0_i32 = arith.constant 0 : i32
    %c0_i32_0 = arith.constant 0 : i32
    return %arg0, %arg1, %c0_i32 : i32, i32, i32
  }
  func.func @transform_2(%arg0: i32, %arg1: i32) -> (i32, i32, i32) {
    %c1_i32 = arith.constant 1 : i32
    %0 = arith.addi %arg1, %c1_i32 : i32
    %c2_i32 = arith.constant 2 : i32
    %1 = arith.muli %0, %c2_i32 : i32
    %c1_i32_0 = arith.constant 1 : i32
    %2 = arith.minsi %1, %c1_i32_0 : i32
    %c0_i32 = arith.constant 0 : i32
    %c0_i32_1 = arith.constant 0 : i32
    return %arg0, %2, %c0_i32 : i32, i32, i32
  }
  func.func @transform_3(%arg0: i32, %arg1: i32) -> (i32, i32) {
    %c0_i32 = arith.constant 0 : i32
    %c0_i32_0 = arith.constant 0 : i32
    %c0_i32_1 = arith.constant 0 : i32
    return %c0_i32, %c0_i32_0 : i32, i32
  }
  func.func @transform_4(%arg0: i32, %arg1: i32) -> (i32, i32) {
    %c0_i32 = arith.constant 0 : i32
    %c0_i32_0 = arith.constant 0 : i32
    %c0_i32_1 = arith.constant 0 : i32
    return %c0_i32, %c0_i32_0 : i32, i32
  }
  func.func @transform_5(%arg0: i32, %arg1: i32) -> (i32, i32) {
    %c0_i32 = arith.constant 0 : i32
    %c0_i32_0 = arith.constant 0 : i32
    %c0_i32_1 = arith.constant 0 : i32
    return %c0_i32, %c0_i32_0 : i32, i32
  }
  func.func @transform_6(%arg0: i32, %arg1: i32) -> (i32, i32) {
    %c0_i32 = arith.constant 0 : i32
    %c0_i32_0 = arith.constant 0 : i32
    %c0_i32_1 = arith.constant 0 : i32
    return %c0_i32, %c0_i32_0 : i32, i32
  }
  func.func @transform_7(%arg0: i32, %arg1: i32) -> (i32, i32) {
    %c0_i32 = arith.constant 0 : i32
    %c0_i32_0 = arith.constant 0 : i32
    %c0_i32_1 = arith.constant 0 : i32
    return %c0_i32, %c0_i32_0 : i32, i32
  }
  func.func @transform_8(%arg0: i32, %arg1: i32) -> (i32, i32) {
    %c0_i32 = arith.constant 0 : i32
    %c0_i32_0 = arith.constant 0 : i32
    %c0_i32_1 = arith.constant 0 : i32
    return %c0_i32, %c0_i32_0 : i32, i32
  }
  func.func @transform_9(%arg0: i32, %arg1: i32) -> (i32, i32) {
    %c0_i32 = arith.constant 0 : i32
    %c0_i32_0 = arith.constant 0 : i32
    %c0_i32_1 = arith.constant 0 : i32
    return %c0_i32, %c0_i32_0 : i32, i32
  }
  func.func @transform_10(%arg0: i32, %arg1: i32) -> (i32, i32) {
    %c0_i32 = arith.constant 0 : i32
    %c0_i32_0 = arith.constant 0 : i32
    %c0_i32_1 = arith.constant 0 : i32
    return %c0_i32, %c0_i32_0 : i32, i32
  }
  func.func @transform_11(%arg0: i32, %arg1: i32) -> (i32, i32, i32) {
    %c0_i32 = arith.constant 0 : i32
    %c0_i32_0 = arith.constant 0 : i32
    return %arg0, %arg1, %c0_i32 : i32, i32, i32
  }
}

module attributes {stable_mosaic.version = 11 : i64} {
  func.func @kernel(%arg0: i32, %arg1: i32, %arg2: memref<1x8x32xf32, #tpu.memory_space<vmem>>, %arg3: memref<1x16x32xf32, #tpu.memory_space<vmem>>, %arg4: memref<1x8x32xf32, #tpu.memory_space<vmem>>, %arg5: memref<1x32xf32, #tpu.memory_space<vmem>>, %arg6: memref<1x32xf32, #tpu.memory_space<vmem>>, %arg7: memref<32x64xf32, #tpu.memory_space<vmem>>, %arg8: memref<1x64xf32, #tpu.memory_space<vmem>>, %arg9: memref<32x24xf32, #tpu.memory_space<vmem>>, %arg10: memref<1x24xf32, #tpu.memory_space<vmem>>, %arg11: memref<8x32xf32, #tpu.memory_space<vmem>>, %arg12: memref<1x32xf32, #tpu.memory_space<vmem>>, %arg13: memref<1x16x32xf32, #tpu.memory_space<vmem>>) attributes {dimension_semantics = [#tpu.dimension_semantics<parallel>, #tpu.dimension_semantics<parallel>], iteration_bounds = array<i64: 2, 1>, scalar_prefetch = 0 : i64, scratch_operands = 0 : i64, tpu.core_type = #tpu.core_type<tc>, window_params = [{transform_indices = @transform_0, window_bounds = array<i64: 1, 8, 32>}, {transform_indices = @transform_1, window_bounds = array<i64: 1, 16, 32>}, {transform_indices = @transform_2, window_bounds = array<i64: 1, 8, 32>}, {pipeline_mode = #tpu.pipeline_mode<synchronous>, transform_indices = @transform_3, window_bounds = array<i64: 1, 32>}, {pipeline_mode = #tpu.pipeline_mode<synchronous>, transform_indices = @transform_4, window_bounds = array<i64: 1, 32>}, {pipeline_mode = #tpu.pipeline_mode<synchronous>, transform_indices = @transform_5, window_bounds = array<i64: 32, 64>}, {pipeline_mode = #tpu.pipeline_mode<synchronous>, transform_indices = @transform_6, window_bounds = array<i64: 1, 64>}, {pipeline_mode = #tpu.pipeline_mode<synchronous>, transform_indices = @transform_7, window_bounds = array<i64: 32, 24>}, {pipeline_mode = #tpu.pipeline_mode<synchronous>, transform_indices = @transform_8, window_bounds = array<i64: 1, 24>}, {pipeline_mode = #tpu.pipeline_mode<synchronous>, transform_indices = @transform_9, window_bounds = array<i64: 8, 32>}, {pipeline_mode = #tpu.pipeline_mode<synchronous>, transform_indices = @transform_10, window_bounds = array<i64: 1, 32>}, {transform_indices = @transform_11, window_bounds = array<i64: 1, 16, 32>}]} {
    %c0 = arith.constant 0 : index
    %c0_0 = arith.constant 0 : index
    %c0_1 = arith.constant 0 : index
    %0 = vector.load %arg3[%c0, %c0_0, %c0_1] : memref<1x16x32xf32, #tpu.memory_space<vmem>>, vector<1x16x32xf32>
    %1 = vector.shape_cast %0 : vector<1x16x32xf32> to vector<16x32xf32>
    %c0_2 = arith.constant 0 : index
    %c0_3 = arith.constant 0 : index
    %c0_4 = arith.constant 0 : index
    %2 = vector.load %arg2[%c0_2, %c0_3, %c0_4] : memref<1x8x32xf32, #tpu.memory_space<vmem>>, vector<1x8x32xf32>
    %3 = vector.shape_cast %2 : vector<1x8x32xf32> to vector<8x32xf32>
    %c0_5 = arith.constant 0 : index
    %c0_6 = arith.constant 0 : index
    %c0_7 = arith.constant 0 : index
    %4 = vector.load %arg4[%c0_5, %c0_6, %c0_7] : memref<1x8x32xf32, #tpu.memory_space<vmem>>, vector<1x8x32xf32>
    %5 = vector.shape_cast %4 : vector<1x8x32xf32> to vector<8x32xf32>
    %6 = tpu.concatenate %3, %1, %5 in 0 : vector<8x32xf32>, vector<16x32xf32>, vector<8x32xf32> -> vector<32x32xf32>
    %cst = arith.constant dense<0.000000e+00> : vector<32xf32>
    %7 = vector.multi_reduction <add>, %6, %cst [1] : vector<32x32xf32> to vector<32xf32>
    %8 = vector.shape_cast %7 : vector<32xf32> to vector<32x1xf32>
    %cst_8 = arith.constant 3.200000e+01 : f32
    %9 = vector.broadcast %cst_8 : f32 to vector<32x1xf32>
    %10 = arith.divf %8, %9 : vector<32x1xf32>
    %11 = vector.broadcast %10 : vector<32x1xf32> to vector<32x32xf32>
    %12 = arith.subf %6, %11 : vector<32x32xf32>
    %13 = arith.mulf %12, %12 : vector<32x32xf32>
    %cst_9 = arith.constant dense<0.000000e+00> : vector<32xf32>
    %14 = vector.multi_reduction <add>, %13, %cst_9 [1] : vector<32x32xf32> to vector<32xf32>
    %15 = vector.shape_cast %14 : vector<32xf32> to vector<32x1xf32>
    %cst_10 = arith.constant 3.200000e+01 : f32
    %16 = vector.broadcast %cst_10 : f32 to vector<32x1xf32>
    %17 = arith.divf %15, %16 : vector<32x1xf32>
    %18 = vector.broadcast %10 : vector<32x1xf32> to vector<32x32xf32>
    %19 = arith.subf %6, %18 : vector<32x32xf32>
    %cst_11 = arith.constant 9.99999974E-6 : f32
    %20 = vector.broadcast %cst_11 : f32 to vector<32x1xf32>
    %21 = arith.addf %17, %20 : vector<32x1xf32>
    %22 = math.rsqrt %21 : vector<32x1xf32>
    %23 = vector.broadcast %22 : vector<32x1xf32> to vector<32x32xf32>
    %24 = arith.mulf %19, %23 : vector<32x32xf32>
    %c0_12 = arith.constant 0 : index
    %c0_13 = arith.constant 0 : index
    %25 = vector.load %arg5[%c0_12, %c0_13] : memref<1x32xf32, #tpu.memory_space<vmem>>, vector<1x32xf32>
    %26 = vector.broadcast %25 : vector<1x32xf32> to vector<32x32xf32>
    %27 = arith.mulf %24, %26 : vector<32x32xf32>
    %c0_14 = arith.constant 0 : index
    %c0_15 = arith.constant 0 : index
    %28 = vector.load %arg6[%c0_14, %c0_15] : memref<1x32xf32, #tpu.memory_space<vmem>>, vector<1x32xf32>
    %29 = vector.broadcast %28 : vector<1x32xf32> to vector<32x32xf32>
    %30 = arith.addf %27, %29 : vector<32x32xf32>
    %c0_16 = arith.constant 0 : index
    %c0_17 = arith.constant 0 : index
    %31 = vector.load %arg7[%c0_16, %c0_17] : memref<32x64xf32, #tpu.memory_space<vmem>>, vector<32x64xf32>
    %cst_18 = arith.constant dense<0.000000e+00> : vector<32x64xf32>
    %32 = tpu.matmul %30, %31, %cst_18 {dimension_numbers = #tpu.dot_dimension_numbers<[1], [0], [0], [1], [0, 0, 1, 1], [], []>} : vector<32x32xf32>, vector<32x64xf32>, vector<32x64xf32> -> vector<32x64xf32>
    %c0_19 = arith.constant 0 : index
    %c0_20 = arith.constant 0 : index
    %33 = vector.load %arg8[%c0_19, %c0_20] : memref<1x64xf32, #tpu.memory_space<vmem>>, vector<1x64xf32>
    %34 = vector.broadcast %33 : vector<1x64xf32> to vector<32x64xf32>
    %35 = arith.addf %32, %34 : vector<32x64xf32>
    %36 = vector.extract_strided_slice %35 {offsets = [0, 0], sizes = [32, 32], strides = [1, 1]} : vector<32x64xf32> to vector<32x32xf32>
    %37 = vector.extract_strided_slice %35 {offsets = [0, 32], sizes = [32, 32], strides = [1, 1]} : vector<32x64xf32> to vector<32x32xf32>
    %cst_21 = arith.constant 0.000000e+00 : f32
    %38 = vector.broadcast %cst_21 : f32 to vector<32x32xf32>
    %39 = arith.subf %38, %37 : vector<32x32xf32>
    %40 = math.exp %39 : vector<32x32xf32>
    %cst_22 = arith.constant 1.000000e+00 : f32
    %41 = vector.broadcast %cst_22 : f32 to vector<32x32xf32>
    %42 = arith.addf %41, %40 : vector<32x32xf32>
    %43 = tpu.reciprocal %42 {approx = true} : vector<32x32xf32> -> vector<32x32xf32>
    %44 = arith.mulf %36, %43 : vector<32x32xf32>
    %45 = tpu.iota {dimensions = array<i32: 0>} : vector<32x1xi32>
    %c16_i32 = arith.constant 16 : i32
    %46 = arith.muli %arg1, %c16_i32 : i32
    %c8_i32 = arith.constant 8 : i32
    %47 = arith.subi %46, %c8_i32 : i32
    %48 = vector.broadcast %47 : i32 to vector<32x1xi32>
    %49 = arith.addi %48, %45 : vector<32x1xi32>
    %c0_i32 = arith.constant 0 : i32
    %50 = vector.broadcast %c0_i32 : i32 to vector<32x1xi32>
    %51 = arith.cmpi sge, %49, %50 : vector<32x1xi32>
    %c16_i32_23 = arith.constant 16 : i32
    %52 = vector.broadcast %c16_i32_23 : i32 to vector<32x1xi32>
    %53 = arith.cmpi slt, %49, %52 : vector<32x1xi32>
    %54 = arith.andi %51, %53 : vector<32x1xi1>
    %cst_24 = arith.constant 0.000000e+00 : f32
    %55 = vector.shape_cast %54 : vector<32x1xi1> to vector<32x1xi1>
    %56 = vector.broadcast %55 : vector<32x1xi1> to vector<32x32xi1>
    %57 = vector.broadcast %cst_24 : f32 to vector<32x32xf32>
    %58 = arith.select %56, %44, %57 : vector<32x32xi1>, vector<32x32xf32>
    %59 = vector.extract_strided_slice %58 {offsets = [8, 0], sizes = [16, 32], strides = [1, 1]} : vector<32x32xf32> to vector<16x32xf32>
    %c0_25 = arith.constant 0 : index
    %c0_26 = arith.constant 0 : index
    %60 = vector.load %arg9[%c0_25, %c0_26] : memref<32x24xf32, #tpu.memory_space<vmem>>, vector<32x24xf32>
    %cst_27 = arith.constant dense<0.000000e+00> : vector<16x24xf32>
    %61 = tpu.matmul %59, %60, %cst_27 {dimension_numbers = #tpu.dot_dimension_numbers<[1], [0], [0], [1], [0, 0, 1, 1], [], []>} : vector<16x32xf32>, vector<32x24xf32>, vector<16x24xf32> -> vector<16x24xf32>
    %c0_28 = arith.constant 0 : index
    %c0_29 = arith.constant 0 : index
    %62 = vector.load %arg10[%c0_28, %c0_29] : memref<1x24xf32, #tpu.memory_space<vmem>>, vector<1x24xf32>
    %63 = vector.broadcast %62 : vector<1x24xf32> to vector<16x24xf32>
    %64 = arith.addf %61, %63 : vector<16x24xf32>
    %65 = vector.extract_strided_slice %64 {offsets = [0, 0], sizes = [16, 8], strides = [1, 1]} : vector<16x24xf32> to vector<16x8xf32>
    %66 = vector.extract_strided_slice %64 {offsets = [0, 8], sizes = [16, 8], strides = [1, 1]} : vector<16x24xf32> to vector<16x8xf32>
    %67 = vector.extract_strided_slice %64 {offsets = [0, 16], sizes = [16, 8], strides = [1, 1]} : vector<16x24xf32> to vector<16x8xf32>
    %68 = arith.maximumf %65, %66 : vector<16x8xf32>
    %69 = arith.maximumf %68, %67 : vector<16x8xf32>
    %70 = arith.subf %65, %69 : vector<16x8xf32>
    %71 = math.exp %70 : vector<16x8xf32>
    %72 = arith.subf %66, %69 : vector<16x8xf32>
    %73 = math.exp %72 : vector<16x8xf32>
    %74 = arith.subf %67, %69 : vector<16x8xf32>
    %75 = math.exp %74 : vector<16x8xf32>
    %76 = arith.addf %71, %73 : vector<16x8xf32>
    %77 = arith.addf %76, %75 : vector<16x8xf32>
    %78 = tpu.reciprocal %77 {approx = true} : vector<16x8xf32> -> vector<16x8xf32>
    %c0_30 = arith.constant 0 : index
    %c0_31 = arith.constant 0 : index
    %79 = vector.load %arg11[%c0_30, %c0_31] : memref<8x32xf32, #tpu.memory_space<vmem>>, vector<8x32xf32>
    %cst_32 = arith.constant 0.000000e+00 : f32
    %80 = vector.broadcast %cst_32 : f32 to vector<16x32xf32>
    %81 = arith.mulf %71, %78 : vector<16x8xf32>
    %cst_33 = arith.constant dense<0.000000e+00> : vector<16x32xf32>
    %82 = tpu.matmul %81, %79, %cst_33 {dimension_numbers = #tpu.dot_dimension_numbers<[1], [0], [0], [1], [0, 0, 1, 1], [], []>} : vector<16x8xf32>, vector<8x32xf32>, vector<16x32xf32> -> vector<16x32xf32>
    %c1_i32 = arith.constant 1 : i32
    %83 = tpu.dynamic_rotate %58 by %c1_i32 dim 0 : vector<32x32xf32>, i32 -> vector<32x32xf32>
    %84 = vector.extract_strided_slice %83 {offsets = [8, 0], sizes = [16, 32], strides = [1, 1]} : vector<32x32xf32> to vector<16x32xf32>
    %85 = arith.mulf %82, %84 : vector<16x32xf32>
    %86 = arith.addf %80, %85 : vector<16x32xf32>
    %87 = arith.mulf %73, %78 : vector<16x8xf32>
    %cst_34 = arith.constant dense<0.000000e+00> : vector<16x32xf32>
    %88 = tpu.matmul %87, %79, %cst_34 {dimension_numbers = #tpu.dot_dimension_numbers<[1], [0], [0], [1], [0, 0, 1, 1], [], []>} : vector<16x8xf32>, vector<8x32xf32>, vector<16x32xf32> -> vector<16x32xf32>
    %89 = arith.mulf %88, %59 : vector<16x32xf32>
    %90 = arith.addf %86, %89 : vector<16x32xf32>
    %91 = arith.mulf %75, %78 : vector<16x8xf32>
    %cst_35 = arith.constant dense<0.000000e+00> : vector<16x32xf32>
    %92 = tpu.matmul %91, %79, %cst_35 {dimension_numbers = #tpu.dot_dimension_numbers<[1], [0], [0], [1], [0, 0, 1, 1], [], []>} : vector<16x8xf32>, vector<8x32xf32>, vector<16x32xf32> -> vector<16x32xf32>
    %c31_i32 = arith.constant 31 : i32
    %93 = tpu.dynamic_rotate %58 by %c31_i32 dim 0 : vector<32x32xf32>, i32 -> vector<32x32xf32>
    %94 = vector.extract_strided_slice %93 {offsets = [8, 0], sizes = [16, 32], strides = [1, 1]} : vector<32x32xf32> to vector<16x32xf32>
    %95 = arith.mulf %92, %94 : vector<16x32xf32>
    %96 = arith.addf %90, %95 : vector<16x32xf32>
    %c0_36 = arith.constant 0 : index
    %c0_37 = arith.constant 0 : index
    %97 = vector.load %arg12[%c0_36, %c0_37] : memref<1x32xf32, #tpu.memory_space<vmem>>, vector<1x32xf32>
    %98 = vector.broadcast %97 : vector<1x32xf32> to vector<16x32xf32>
    %99 = arith.addf %96, %98 : vector<16x32xf32>
    %100 = arith.addf %99, %1 : vector<16x32xf32>
    %c0_38 = arith.constant 0 : index
    %c0_39 = arith.constant 0 : index
    %c0_40 = arith.constant 0 : index
    %101 = vector.load %arg13[%c0_38, %c0_39, %c0_40] : memref<1x16x32xf32, #tpu.memory_space<vmem>>, vector<1x16x32xf32>
    %102 = vector.shape_cast %101 : vector<1x16x32xf32> to vector<16x32xf32>
    %103 = vector.shape_cast %100 : vector<16x32xf32> to vector<1x16x32xf32>
    tpu.vector_store %arg13[%c0_38, %c0_39, %c0_40], %103 {strides = array<i32>} : memref<1x16x32xf32, #tpu.memory_space<vmem>>, vector<1x16x32xf32>,
    return
  }
  func.func @transform_0(%arg0: i32, %arg1: i32) -> (i32, i32, i32) {
    %c2_i32 = arith.constant 2 : i32
    %0 = arith.muli %arg1, %c2_i32 : i32
    %c1_i32 = arith.constant 1 : i32
    %1 = arith.subi %0, %c1_i32 : i32
    %c0_i32 = arith.constant 0 : i32
    %2 = arith.maxsi %1, %c0_i32 : i32
    %c0_i32_0 = arith.constant 0 : i32
    %c0_i32_1 = arith.constant 0 : i32
    return %arg0, %2, %c0_i32_0 : i32, i32, i32
  }
  func.func @transform_1(%arg0: i32, %arg1: i32) -> (i32, i32, i32) {
    %c0_i32 = arith.constant 0 : i32
    %c0_i32_0 = arith.constant 0 : i32
    return %arg0, %arg1, %c0_i32 : i32, i32, i32
  }
  func.func @transform_2(%arg0: i32, %arg1: i32) -> (i32, i32, i32) {
    %c1_i32 = arith.constant 1 : i32
    %0 = arith.addi %arg1, %c1_i32 : i32
    %c2_i32 = arith.constant 2 : i32
    %1 = arith.muli %0, %c2_i32 : i32
    %c1_i32_0 = arith.constant 1 : i32
    %2 = arith.minsi %1, %c1_i32_0 : i32
    %c0_i32 = arith.constant 0 : i32
    %c0_i32_1 = arith.constant 0 : i32
    return %arg0, %2, %c0_i32 : i32, i32, i32
  }
  func.func @transform_3(%arg0: i32, %arg1: i32) -> (i32, i32) {
    %c0_i32 = arith.constant 0 : i32
    %c0_i32_0 = arith.constant 0 : i32
    %c0_i32_1 = arith.constant 0 : i32
    return %c0_i32, %c0_i32_0 : i32, i32
  }
  func.func @transform_4(%arg0: i32, %arg1: i32) -> (i32, i32) {
    %c0_i32 = arith.constant 0 : i32
    %c0_i32_0 = arith.constant 0 : i32
    %c0_i32_1 = arith.constant 0 : i32
    return %c0_i32, %c0_i32_0 : i32, i32
  }
  func.func @transform_5(%arg0: i32, %arg1: i32) -> (i32, i32) {
    %c0_i32 = arith.constant 0 : i32
    %c0_i32_0 = arith.constant 0 : i32
    %c0_i32_1 = arith.constant 0 : i32
    return %c0_i32, %c0_i32_0 : i32, i32
  }
  func.func @transform_6(%arg0: i32, %arg1: i32) -> (i32, i32) {
    %c0_i32 = arith.constant 0 : i32
    %c0_i32_0 = arith.constant 0 : i32
    %c0_i32_1 = arith.constant 0 : i32
    return %c0_i32, %c0_i32_0 : i32, i32
  }
  func.func @transform_7(%arg0: i32, %arg1: i32) -> (i32, i32) {
    %c0_i32 = arith.constant 0 : i32
    %c0_i32_0 = arith.constant 0 : i32
    %c0_i32_1 = arith.constant 0 : i32
    return %c0_i32, %c0_i32_0 : i32, i32
  }
  func.func @transform_8(%arg0: i32, %arg1: i32) -> (i32, i32) {
    %c0_i32 = arith.constant 0 : i32
    %c0_i32_0 = arith.constant 0 : i32
    %c0_i32_1 = arith.constant 0 : i32
    return %c0_i32, %c0_i32_0 : i32, i32
  }
  func.func @transform_9(%arg0: i32, %arg1: i32) -> (i32, i32) {
    %c0_i32 = arith.constant 0 : i32
    %c0_i32_0 = arith.constant 0 : i32
    %c0_i32_1 = arith.constant 0 : i32
    return %c0_i32, %c0_i32_0 : i32, i32
  }
  func.func @transform_10(%arg0: i32, %arg1: i32) -> (i32, i32) {
    %c0_i32 = arith.constant 0 : i32
    %c0_i32_0 = arith.constant 0 : i32
    %c0_i32_1 = arith.constant 0 : i32
    return %c0_i32, %c0_i32_0 : i32, i32
  }
  func.func @transform_11(%arg0: i32, %arg1: i32) -> (i32, i32, i32) {
    %c0_i32 = arith.constant 0 : i32
    %c0_i32_0 = arith.constant 0 : i32
    return %arg0, %arg1, %c0_i32 : i32, i32, i32
  }
}

</mosaic_0001>

<bundles_post_ra>
// kernel: tpu_custom_call.1
= control target key start
LH: loop header
LB: loop body
LE: loop exit
PB: predicated region body
PF: predicated region fallthrough
CT: control target
= control target key end

     0   :  { %s2212_s0 = inlined_call_operand.vmem [shape: f32[2,16,32], index: 0, kind: input, shape index: {}]   ;;  %s2213_s1 = inlined_call_operand.hbm [shape: f32[2,16,32], index: 1, kind: input, shape index: {}]   ;;  %s2214_s2 = inlined_call_operand.hbm [shape: f32[2,16,32], index: 2, kind: input, shape index: {}]   ;;  %s2215_s3 = inlined_call_operand.vmem [shape: f32[1,32], index: 3, kind: input, shape index: {}]   ;;  %s2216_s4 = inlined_call_operand.vmem [shape: f32[1,32], index: 4, kind: input, shape index: {}]   ;;  %s2217_s5 = inlined_call_operand.vmem [shape: f32[32,64], index: 5, kind: input, shape index: {}]   ;;  %s2218_s6 = inlined_call_operand.vmem [shape: f32[1,64], index: 6, kind: input, shape index: {}]   ;;  %s2219_s7 = inlined_call_operand.vmem [shape: f32[32,24], index: 7, kind: input, shape index: {}]   ;;  %s2220_s8 = inlined_call_operand.vmem [shape: f32[1,24], index: 8, kind: input, shape index: {}]   ;;  %s2221_s9 = inlined_call_operand.vmem [shape: f32[8,32], index: 9, kind: input, shape index: {}]   ;;  %s2222_s10 = inlined_call_operand.vmem [shape: f32[1,32], index: 10, kind: input, shape index: {}]   ;;  %s2223_s11 = inlined_call_operand.hbm [shape: f32[2,16,32], index: 11, kind: output, shape index: {}]  }
   0x1   :  { %2232 = sst [smem:[#allocation16_spill]] %s2213_s1 }
   0x2   :  { %2233 = sst [smem:[#allocation17_spill]] %s2223_s11 }
   0x3   :  { %16 = vsyncpa [#allocation3], 0 }
   0x4   :  { %18 = vsyncpa [#allocation3 + $0x1], 0 }
   0x5   :  { %19 = vsyncpa [#allocation6], 0 }
   0x6   :  { %21 = vsyncpa [#allocation6 + $0x1], 0 }
   0x7   :  { %22 = vsyncpa [#allocation4], 0 }
   0x8   :  { %24 = vsyncpa [#allocation4 + $0x1], 0  ;;  %s1876_s17 = smov 0   ;;  %s1878_s18 = smov 0  }
   0x9   :  { %s1880_s19 = smov 0   ;;  %s1882_s20 = smov 0  }
   0xa   :  { %s1884_s21 = smov 0   ;;  %s1886_s22 = smov 0  }
   0xb LB: > { %2234 = sst [smem:[#allocation11_spill]] %s1782_s17  ;;  %s1425_s23 = sadd.s32 4294967295, %s1802_s22   ;;  %s1802_s22 = sphi %s1886_s22, %s30_s22   ;;  %s1798_s21 = sphi %s1884_s21, %s2263_s21   ;;  %s1794_s20 = sphi %s1882_s20, %s2262_s20   ;;  %s1790_s19 = sphi %s1880_s19, %s2258_s19   ;;  %s1786_s18 = sphi %s1878_s18, %s2261_s18   ;;  %s1782_s17 = sphi %s1876_s17, %s2260_s17  }
   0xc   : > { %2235 = sst [smem:[#allocation12_spill]] %s1790_s19  ;;  %s1426_s24 = sadd.s32 4294967294, %s1802_s22  }
   0xd   : > { %s42_s25 = sadd.s32 1, %s1798_s21  ;;  %s87_s26 = sadd.s32 1, %s1790_s19 }
   0xe   : > { %p44_p0 = scmp.ge.s32.totalorder %s42_s25, 2  ;;  %p94_p1 = scmp.ne.s32.totalorder %s1790_s19, %s1786_s18 }
   0xf   : > { %p95_p2 = scmp.eq.s32.totalorder %s1802_s22, 0  ;;  %p100_p3 = scmp.ne.s32.totalorder %s1786_s18, %s1782_s17 }
  0x10   : > { %s2265_s25 = smov (%p44_p0, %s42_s25), 0  ;;  %p101_p5 = scmp.eq.s32.totalorder %s1425_s23, 0 }
  0x11   : > { %2236 = sst [smem:[#allocation13_spill]] %s2265_s25  ;;  %p1917_p4 = por %p95_p2, %p94_p1 }
  0x12   : > { %s82_s28 = ssub.s32 %s1798_s21, %s2265_s25  ;;  %p330_p6 = scmp.eq.s32.totalorder %s1425_s23, 1 }
  0x13   : > { %p85_p7 = scmp.eq.s32.totalorder %s82_s28, 0  ;;  %p1923_p8 = por %p101_p5, %p100_p3 }
  0x14   : > { %p1927_p9 = por %p330_p6, %p94_p1  ;;  %p336_p10 = scmp.eq.s32.totalorder %s1426_s24, 1 }
  0x15   : > { %s2238_s29 = scalar_select %p1923_p8, 1, 0 }
  0x16   : > { %s2239_s30 = scalar_select %p1927_p9, 1, 0 }
  0x17   : > { %s1932_s12 = scalar_select %p85_p7, %s1790_s19, %s87_s26  }
  0x18   : > { %p1934_p11 = por %p336_p10, %p100_p3  ;;  %p1565_p13 = scmp.lt.s32.totalorder %s1802_s22, 2 }
  0x19   : > { %2240 = sst [smem:[#allocation14_spill]] %s1932_s12  ;;  %s1941_s14 = sand.u32 1, %s1790_s19  }
  0x1a   : > { %s2241_s13 = scalar_select %p1934_p11, 1, 0 }
  0x1b   : > { %s1429_s15 = sshll.u32 %s1941_s14, 4  ;;  %s2226_s16 = sshll.u32 %s1798_s21, 8 }
  0x1c   : > { %2242 = sst [smem:[#allocation15_spill]] %s2241_s13  ;;  %s2243_s1 = sld [smem:[#allocation16_spill]] }
  0x1d   : > { %s403_s24 = scalar_lea.vmem [#allocation2], %s1429_s15  ;;  %p1956_p0 = pnand %p1565_p13, %p1917_p4 }
  0x1e   : > { %s412_s26 = sshll.u32 %s403_s24, 4  ;;  %s1952_s26 = int_to_ptr.vmem [resolvable:$true] %s412_s26 }
  0x1f   : > { %p1658_p3 = pneg %p1956_p0 }
  0x22   : > { %s1950_s25 = scalar_lea.hbm %s2243_s1, %s2226_s16  ;;  %s1661_s27 = scalar_lea.hbm %s2243_s1, 512 }
  0x23   : > { %s1656_s23 = scalar_lea.hbm %s1950_s25, 256  ;;  %p1662_p4 = scmp.lt.u32.totalorder %s1950_s25, %s2243_s1 }
  0x24   : > { %p1657_p2 = scmp.ne.s32.totalorder %s1950_s25, %s1656_s23  ;;  %p1663_p7 = scmp.lt.u32.totalorder %s1661_s27, %s1656_s23 }
  0x25   : > { %p1665_p13 = scmp.lt.u32.totalorder %s1656_s23, %s1950_s25 }
  0x26   : > { %p1659_p5 = pnand %p1658_p3, %p1657_p2  ;;  %p1664_p10 = por %p1663_p7, %p1662_p4 }
  0x28   : > { %p1660_p6 = pneg %p1659_p5  ;;  %p1666_p12 = por %p1665_p13, %p1664_p10 }
  0x2a   : > { %p1667_p1 = pnand %p1666_p12, %p1660_p6 }
  0x2c   : > { %1670 = shalt.err (!%p1667_p1)
}
  0x2d   : > { %s1671_s19 = scalar_lea.vmem %s1952_s26, 256  ;;  %s1804_s15 = smov [#allocation2]  }
  0x2e   : > { %p1672_p2 = scmp.ne.s32.totalorder %s1952_s26, %s1671_s19  ;;  %s1676_s28 = sshll.u32 %s1804_s15, 4  ;;  %s1677_s28 = int_to_ptr.vmem [resolvable:$false] %s1676_s28 }
  0x2f   : > { %s1678_s16 = scalar_lea.vmem %s1677_s28, 512  ;;  %p1679_p9 = scmp.lt.s32.totalorder %s1952_s26, %s1677_s28 }
  0x30   : > { %p1674_p5 = pnand %p1672_p2, %p1658_p3  ;;  %p1680_p4 = scmp.lt.s32.totalorder %s1678_s16, %s1671_s19 }
  0x32   : > { %p1675_p11 = pneg %p1674_p5  ;;  %p1681_p7 = por %p1680_p4, %p1679_p9 }
  0x34   : > { %p1682_p10 = pnand %p1681_p7, %p1675_p11 }
  0x36   : > { %1685 = shalt.err (!%p1682_p10)
}
  0x37   : > { %s1805_s23 = smov 128   ;;  %s1806_s27 = smov 8  }
  0x38   : > { %s2245_s24 = scalar_lea.sflag [#allocation3], %s1941_s14  ;;  %p444_p12 = scmp.lt.s32.totalorder %s1802_s22, 3 }
  0x39   : > { %1557 = dma.hbm_to_vmem [thread:$0]  (!%p1956_p0), %s1950_s25, 256, %s1952_s26, %s2245_s24, %s1805_s23, %s1805_s23, %s1806_s27  }
  0x3a   : > { %s1432_s19 = sshll.u32 %s1941_s14, 3  ;;  %s2246_s15 = sshll.u32 %s1798_s21, 8 }
  0x3b   : > { %s1465_s28 = sadd.s32 128, %s2246_s15  ;;  %p2247_p9 = scmp.ge.s32.totalorder %s1802_s22, 1 }
  0x3c   : > { %s2002_s17 = scalar_lea.hbm %s2214_s2, %s1465_s28  ;;  %s426_s11 = scalar_lea.vmem [#allocation5], %s1432_s19 }
  0x3d   : > { %p1995_p11 = pnand %p2247_p9, %p444_p12  ;;  %s439_s25 = sshll.u32 %s426_s11, 4  ;;  %s440_s25 = int_to_ptr.vmem [resolvable:$true] %s439_s25 }
  0x3e   : > { %s423_s26 = scalar_lea.sflag [#allocation6], %s1941_s14  ;;  %s1686_s23 = scalar_lea.hbm %s2002_s17, 128 }
  0x3f   : > { %s2248_s16 = scalar_select %p1995_p11, 1, 0 }
  0x40   : > { %p1687_p1 = scmp.ne.s32.totalorder %s2002_s17, %s1686_s23  ;;  %s1691_s1 = scalar_lea.hbm %s2214_s2, 512 }
  0x41   : > { %p1692_p2 = scmp.lt.u32.totalorder %s2002_s17, %s2214_s2  ;;  %p1693_p5 = scmp.lt.u32.totalorder %s1691_s1, %s1686_s23 }
  0x42   : > { %p1689_p6 = pnand %p1687_p1, %p1658_p3  ;;  %p1695_p7 = scmp.lt.u32.totalorder %s1686_s23, %s2002_s17 }
  0x43   : > { %p1694_p4 = por %p1693_p5, %p1692_p2 }
  0x44   : > { %p1690_p13 = pneg %p1689_p6 }
  0x45   : > { %p1696_p10 = por %p1695_p7, %p1694_p4 }
  0x47   : > { %p1697_p12 = pnand %p1696_p10, %p1690_p13 }
  0x49   : > { %1700 = shalt.err (!%p1697_p12)
}
  0x4a   : > { %s1701_s11 = scalar_lea.vmem %s440_s25, 128  ;;  %s1807_s14 = smov [#allocation5]  }
  0x4b   : > { %p1702_p9 = scmp.ne.s32.totalorder %s440_s25, %s1701_s11  ;;  %s1706_s19 = sshll.u32 %s1807_s14, 4  ;;  %s1707_s19 = int_to_ptr.vmem [resolvable:$false] %s1706_s19 }
  0x4c   : > { %s1708_s28 = scalar_lea.vmem %s1707_s19, 256  ;;  %p1709_p8 = scmp.lt.s32.totalorder %s440_s25, %s1707_s19 }
  0x4d   : > { %p1704_p1 = pnand %p1702_p9, %p1658_p3  ;;  %p1710_p11 = scmp.lt.s32.totalorder %s1708_s28, %s1701_s11 }
  0x4f   : > { %p1705_p6 = pneg %p1704_p1  ;;  %p1711_p2 = por %p1710_p11, %p1709_p8 }
  0x51   : > { %p1712_p5 = pnand %p1711_p2, %p1705_p6 }
  0x53   : > { %1715 = shalt.err (!%p1712_p5)
}
  0x54   : > { %1560 = dma.hbm_to_vmem [thread:$0]  (!%p1956_p0), %s2002_s17, 128, %s440_s25, %s423_s26  }
  0x55   : > { %p2249_p13 = scmp.ne.s32.totalorder %s2248_s16, 0 }
  0x56   : > { %s2027_s23 = sand.u32 (!%p2249_p13), 1, %s1786_s18   ;;  %p2250_p8 = scmp.ne.s32.totalorder (!%p2249_p13), %s2238_s29, 0 }
  0x57   : > { %448 = sbr.rel (%p2249_p13) target bundleno = 1859 (0x743), region = 64  ;;  %s1436_s27 = sshll.u32 (!%p2249_p13), %s2027_s23, 4 }
  0x58   : > { %s451_s24 = scalar_lea.sflag (!%p2249_p13), [#allocation3], %s2027_s23  ;;  %s454_s1 = scalar_lea.vmem (!%p2249_p13), [#allocation2], %s1436_s27 }
  0x5e   : > { %1769 = dma.done.wait (%p2250_p8), %s451_s24, 256  }
  0x5f   : > { %1771 = vsyncadd (%p2250_p8), %s451_s24, 4294967040  ;;  %s1437_s17 = sshll.u32 %s2027_s23, 3  ;;  %s460_s12 = scalar_lea.sflag [#allocation6], %s2027_s23 }
  0x60   : > { %s463_s16 = scalar_lea.vmem [#allocation5], %s1437_s17 }
  0x61   : > { %1773 = dma.done.wait (%p2250_p8), %s460_s12, 128  }
  0x62   : > { %1775 = vsyncadd (%p2250_p8), %s460_s12, 4294967168  ;;  %p523_p0 = scmp.lt.s32.totalorder %s1794_s20, 1  ;;  %vm545_vm0 = vcmask 261120   ;;  %v2048_v1 = vld [vmem:[%s454_s1 + $0x8] sm:$0xff]  ;;  %v2050_v2 = vld [vmem:[%s454_s1] sm:$0xff]  ;;  %s1809_s13 = smov 120  }
  0x63   : > { %v552_v4 = vsel %vm545_vm0, %v2048_v1, 0.0  ;;  %v544_v5 = vld [vmem:[%s463_s16] sm:$0xff]  ;;  %v549_v6 = vsel %vm545_vm0, %v2050_v2, 0.0  ;;  %v623_v30 = vld [vmem:[%s2217_s5 + $0x10] sm:$0xff]  ;;  %v624_v32 = vld [vmem:[%s2217_s5 + $0x18] sm:$0xff]  ;;  %s1808_s16 = smov 96  }
  0x64   : > { %s524_s25 = scalar_select %p523_p0, %s1794_s20, 1  ;;  %553 = vadd.xlane.f32.xlu1 %v552_v4  ;;  %v555_v7 = vsel %vm545_vm0, %v544_v5, 0.0  ;;  %v621_v28 = vld [vmem:[%s2217_s5] sm:$0xff]  ;;  %v622_v29 = vld [vmem:[%s2217_s5 + $0x8] sm:$0xff]  ;;  %v1536_v33 = vpack.c.bf16 %v624_v32, %v623_v30  ;;  %vm972_vm1 = vcmask 64512  }
  0x65   : > { %v1532_v31 = vpack.c.bf16 %v622_v29, %v621_v28  ;;  %v1441_v47 = vld [vmem:[%s2215_s3] ss:$0 sm:$0xff]  ;;  %s1810_s15 = smov 112   ;;  %s1812_s29 = smov 16  }
  0x66   : > { %s1466_s26 = sshll.u32 %s524_s25, 4  ;;  %v1442_v49 = vld [vmem:[%s2216_s4] ss:$0 sm:$0xff]  ;;  %s1467_s1 = sshll.u32 %s1794_s20, 8 }
  0x67   : > { %s530_s11 = scalar_lea.vmem %s2212_s0, %s1466_s26  ;;  %1533 = vmatprep.subr.bf16.mxu0 %v1532_v31  ;;  %v1448_v29 = vld [vmem:[%s2220_s8] ss:$0 sm:$0xff]  ;;  %s518_s17 = scalar_lea.vmem [#allocation7], %s1436_s27 }
  0x68   : > { %v543_v0 = vld [vmem:[%s530_s11] sm:$0xff]  ;;  %556 = vadd.xlane.f32.xlu1 %v555_v7  ;;  %1535 = vmatpush3.bf16.msra.mxu0 %v1532_v31  ;;  %s1811_s11 = smov 8   ;;  %s1295_s12 = sshll.u32 %s518_s17, 4  ;;  %s2160_s12 = int_to_ptr.vmem [resolvable:$true] %s1295_s12 }
  0x69   : > { %v546_v3 = vsel %vm545_vm0, %v543_v0, 0.0  ;;  %1537 = vmatprep.subr.bf16.mxu0 %v1536_v33  ;;  %s2251_s26 = sld [smem:[#allocation17_spill]]  ;;  %s1280_s20 = scalar_lea.sflag [#allocation4], %s2027_s23 }
  0x6a   : > { %547 = vadd.xlane.f32.xlu0 %v546_v3  ;;  %v806_v3 = vld [vmem:[%s2219_s7 + $0x8] sm:$0xff]  ;;  %s1716_s27 = scalar_lea.vmem %s2160_s12, 256  ;;  %p2252_p11 = scmp.ne.s32.totalorder %s2239_s30, 0 }
  0x6b   : > { %p1717_p3 = scmp.ne.s32.totalorder %s2160_s12, %s1716_s27 }
  0x6c   : > { %1539 = vmatpush3.bf16.msra.mxu0 %v1536_v33 }
  0x6d   : > { %p1718_p4 = pnand %p1717_p3, %p2252_p11 }
  0x6e   : > { %550 = vadd.xlane.f32.xlu0 %v549_v6 }
  0x6f   : > { %p1719_p7 = pneg %p1718_p4 }
  0xf1   : > { %v554_v9 = vpop.xlane.xlu1 %553 }
  0xf2   : > { %v561_v11 = vmul.f32 0.03125, %v554_v9 }
  0xf4   : > { %v565_v13 = vsub.f32 %v2048_v1, %v561_v11 }
  0xf5   : > { %v557_v15 = vpop.xlane.xlu1 %556 }
  0xf6   : > { %v562_v17 = vmul.f32 0.03125, %v557_v15  ;;  %v569_v19 = vmul.f32 %v565_v13, %v565_v13 }
  0xf7   : > { %v548_v8 = vpop.xlane.xlu0 %547 }
  0xf8   : > { %v559_v10 = vmul.f32 0.03125, %v548_v8  ;;  %v566_v21 = vsub.f32 %v544_v5, %v562_v17  ;;  %v577_v23 = vsel %vm545_vm0, %v569_v19, 0.0  ;;  %v1443_v5 = vld [vmem:[%s2218_s6] ss:$0 sm:$0xff]  ;;  %v808_v19 = vld [vmem:[%s2219_s7 + $0x18] sm:$0xff] }
  0xfa   : > { %v563_v12 = vsub.f32 %v543_v0, %v559_v10  ;;  %v570_v25 = vmul.f32 %v566_v21, %v566_v21  ;;  %v805_v0 = vld [vmem:[%s2219_s7] sm:$0xff] }
  0xfb   : > { %v551_v14 = vpop.xlane.xlu0 %550  ;;  %v1540_v4 = vpack.c.bf16 %v806_v3, %v805_v0 }
  0xfc   : > { %v560_v16 = vmul.f32 0.03125, %v551_v14  ;;  %v567_v18 = vmul.f32 %v563_v12, %v563_v12  ;;  %v580_v27 = vsel %vm545_vm0, %v570_v25, 0.0 }
  0xfd   : > { %1541 = vmatprep.subr.bf16.mxu1 %v1540_v4 }
  0xfe   : > { %v564_v20 = vsub.f32 %v2050_v2, %v560_v16  ;;  %v571_v22 = vsel %vm545_vm0, %v567_v18, 0.0  ;;  %1543 = vmatpush3.bf16.msra.mxu1 %v1540_v4  ;;  %v807_v18 = vld [vmem:[%s2219_s7 + $0x10] sm:$0xff] }
  0xff   : > { %572 = vadd.xlane.f32.xlu0 %v571_v22 }
 0x100   : > { %v568_v24 = vmul.f32 %v564_v20, %v564_v20 }
 0x102   : > { %v574_v26 = vsel %vm545_vm0, %v568_v24, 0.0 }
 0x103   : > { %578 = vadd.xlane.f32.xlu0 %v577_v23  ;;  %575 = vadd.xlane.f32.xlu1 %v574_v26 }
 0x107   : > { %581 = vadd.xlane.f32.xlu1 %v580_v27 }
 0x18c   : > { %v573_v34 = vpop.xlane.xlu0 %572 }
 0x18d   : > { %v583_v35 = vmul.f32 0.03125, %v573_v34 }
 0x18f   : > { %v587_v36 = vadd.f32 1e-05, %v583_v35 }
 0x190   : > { %v576_v37 = vpop.xlane.xlu1 %575  ;;  %v579_v38 = vpop.xlane.xlu0 %578 }
 0x191   : > { %1624 = vrsqrt.f32 %v587_v36  ;;  %v584_v39 = vmul.f32 0.03125, %v576_v37  ;;  %v585_v40 = vmul.f32 0.03125, %v579_v38 }
 0x193   : > { %v588_v41 = vadd.f32 1e-05, %v584_v39  ;;  %v589_v42 = vadd.f32 1e-05, %v585_v40 }
 0x194   : > { %v582_v43 = vpop.xlane.xlu1 %581 }
 0x195   : > { %1626 = vrsqrt.f32 %v588_v41  ;;  %v586_v44 = vmul.f32 0.03125, %v582_v43 }
 0x196   : > { %1628 = vrsqrt.f32 %v589_v42 }
 0x197   : > { %v590_v45 = vadd.f32 1e-05, %v586_v44 }
 0x199   : > { %1630 = vrsqrt.f32 %v590_v45 }
 0x19b   : > { %v1625_v46 = vpop.eup %1624 }
 0x19c   : > { %v595_v48 = vmul.f32 %v1625_v46, %v563_v12 }
 0x19e   : > { %v606_v50 = vmul.f32 %v1441_v47, %v595_v48 }
 0x19f   : > { %v1627_v51 = vpop.eup %1626 }
 0x1a0   : > { %v1629_v52 = vpop.eup %1628  ;;  %v617_v53 = vadd.f32 %v1442_v49, %v606_v50  ;;  %v596_v54 = vmul.f32 %v1627_v51, %v564_v20  ;;  %v1544_v20 = vpack.c.bf16 %v808_v19, %v807_v18 }
 0x1a1   : > { %v597_v55 = vmul.f32 %v1629_v52, %v565_v13 }
 0x1a2   : > { %1500 = vmatprep.mubr.msk.f32.mxu0 %vm545_vm0, %v617_v53  ;;  %v607_v56 = vmul.f32 %v1441_v47, %v596_v54  ;;  %1545 = vmatprep.subr.bf16.mxu1 %v1544_v20 }
 0x1a3   : > { %v1631_v57 = vpop.eup %1630  ;;  %v608_v58 = vmul.f32 %v1441_v47, %v597_v55  ;;  %1547 = vmatpush3.bf16.msra.mxu1 %v1544_v20 }
 0x1a4   : > { %v618_v59 = vadd.f32 %v1442_v49, %v607_v56  ;;  %v598_v60 = vmul.f32 %v1631_v57, %v566_v21  ;;  %v969_v57 = vld [vmem:[%s2221_s9] sm:$0xff] }
 0x1a5   : > { %v619_v61 = vadd.f32 %v1442_v49, %v608_v58  ;;  %1517 = vmatprep.subr.mxu1 %v969_v57  ;;  %1522 = vmatprep.subr.mxu0 %v969_v57 }
 0x1a6   : > { %1501 = vmatmul.mubr.msk.f32.vlgmr.msra.gmra.mrb[0].mxu0 %vm545_vm0, %v618_v59  ;;  %v609_v62 = vmul.f32 %v1441_v47, %v598_v60 }
 0x1a7   : > { %1503 = vmatprep.mubr.msk.f32.mxu0 %vm545_vm0, %v619_v61  ;;  %1523 = vmatpush3.msra.mxu0 %v969_v57 }
 0x1a8   : > { %v620_v63 = vadd.f32 %v1442_v49, %v609_v62 }
 0x1aa   : > { %1504 = vmatmul.mubr.msk.f32.gmra.mrb[2].mxu0 %vm545_vm0, %v620_v63 }
 0x279   : > { %v1502_v6 = vpop.f32.mrb[0].mxu0 }
 0x27a   : > { %v716_v7 = vadd.f32 %v1502_v6, %v1443_v5  ;;  %v710_v8 = vpop.f32.mrb[1].mxu0 }
 0x27c   : > { %v730_v9 = vsub.f32 0.0, %v716_v7 }
 0x27d   : > { %v1505_v10 = vpop.f32.mrb[2].mxu0 }
 0x27e   : > { %v735_v11 = vmul.f32 1.442695, %v730_v9  ;;  %v720_v12 = vpop.f32.mrb[3].mxu0 }
 0x27f   : > { %v721_v13 = vadd.f32 %v1443_v5, %v720_v12 }
 0x280   : > { %1632 = vpow2.f32 %v735_v11 }
 0x281   : > { %v731_v14 = vsub.f32 0.0, %v721_v13 }
 0x283   : > { %v737_v15 = vmul.f32 1.442695, %v731_v14 }
 0x285   : > { %1634 = vpow2.f32 %v737_v15 }
 0x28a   : > { %v1633_v16 = vpop.eup %1632 }
 0x28b   : > { %v742_v17 = vadd.f32 1.0, %v1633_v16 }
 0x28d   : > { %1636 = vrcp.f32 %v742_v17 }
 0x28f   : > { %v1635_v21 = vpop.eup %1634 }
 0x290   : > { %v743_v22 = vadd.f32 1.0, %v1635_v21 }
 0x292   : > { %1638 = vrcp.f32 %v743_v22 }
 0x297   : > { %v1637_v23 = vpop.eup %1636 }
 0x298   : > { %755 = vrot.lane.b32.xlu0 %v1637_v23, %s1808_s16 }
 0x29c   : > { %v1639_v24 = vpop.eup %1638 }
 0x29d   : > { %757 = vrot.lane.b32.xlu1 %v1639_v24, %s1808_s16 }
 0x30a   : > { %v756_v25 = vpop.permute.xlu0 %755 }
 0x30b   : > { %v2101_v26 = vmul.f32 %v756_v25, %v716_v7 }
 0x30d   : > { %1514 = vmatprep.mubr.msk.f32.mxu1 %vm545_vm0, %v2101_v26 }
 0x30f   : > { %v758_v27 = vpop.permute.xlu1 %757 }
 0x310   : > { %v2105_v28 = vmul.f32 %v758_v27, %v721_v13 }
 0x312   : > { %1515 = vmatmul.mubr.msk.f32.vlgmr.msra.gmra.mrb[0].mxu1 %vm545_vm0, %v2105_v28 }
 0x313   : > { %1518 = vmatpush3.msra.mxu1 %v969_v57 }
 0x314   : > { %1527 = vmatprep.subr.mxu1 %v969_v57 }
 0x3e5   : > { %v1516_v30 = vpop.f32.mrb[0].mxu1 }
 0x3e6   : > { %v894_v31 = vadd.f32 %v1516_v30, %v1448_v29  ;;  %v888_v32 = vpop.f32.mrb[1].mxu1 }
 0x3e7   : > { %v889_v33 = vadd.f32 %v1448_v29, %v888_v32 }
 0x3e8   : > { %901 = vrot.lane.b32.xlu1 %v894_v31, %s1809_s13 }
 0x3e9   : > { %907 = vrot.lane.b32.xlu0 %v889_v33, %s1810_s15 }
 0x3ec   : > { %899 = vrot.lane.b32.xlu1 %v889_v33, %s1809_s13 }
 0x3f0   : > { %909 = vrot.lane.b32.xlu1 %v894_v31, %s1810_s15 }
 0x45a   : > { %v902_v34 = vpop.permute.xlu1 %901 }
 0x45b   : > { %v908_v37 = vpop.permute.xlu0 %907  ;;  %v906_v38 = vmax.f32 %v894_v31, %v902_v34  ;;  %v1055_v34 = vrot.slane %v2101_v26, 7 }
 0x45e   : > { %v900_v35 = vpop.permute.xlu1 %899 }
 0x45f   : > { %v905_v36 = vmax.f32 %v889_v33, %v900_v35  ;;  %v1813_v35 = vmov 0.0  }
 0x461   : > { %v913_v39 = vmax.f32 %v905_v36, %v908_v37  ;;  %v1054_v36 = vrot.slane %v1813_v35, 7 }
 0x462   : > { %v910_v40 = vpop.permute.xlu1 %909 }
 0x463   : > { %v914_v41 = vmax.f32 %v906_v38, %v910_v40  ;;  %923 = vrot.lane.b32.xlu0 %v913_v39, %s1811_s11  ;;  %v915_v59 = vsub.f32 %v889_v33, %v913_v39  ;;  %v1258_v40 = vrot.slane %v1813_v35, 1 }
 0x465   : > { %925 = vrot.lane.b32.xlu1 %v914_v41, %s1811_s11  ;;  %v916_v60 = vsub.f32 %v894_v31, %v914_v41  ;;  %v917_v61 = vmul.f32 1.442695, %v915_v59 }
 0x467   : > { %935 = vrot.lane.b32.xlu0 %v913_v39, %s1812_s29  ;;  %v919_v62 = vmul.f32 1.442695, %v916_v60  ;;  %v1257_v39 = vrot.slane %v2105_v28, 1 }
 0x469   : > { %937 = vrot.lane.b32.xlu1 %v914_v41, %s1812_s29 }
 0x4d5   : > { %v924_v42 = vpop.permute.xlu0 %923 }
 0x4d6   : > { %v929_v43 = vsub.f32 %v889_v33, %v924_v42 }
 0x4d7   : > { %v926_v44 = vpop.permute.xlu1 %925 }
 0x4d8   : > { %v931_v45 = vmul.f32 1.442695, %v929_v43  ;;  %v930_v46 = vsub.f32 %v894_v31, %v926_v44 }
 0x4d9   : > { %v936_v47 = vpop.permute.xlu0 %935 }
 0x4da   : > { %1640 = vpow2.f32 %v931_v45  ;;  %v933_v48 = vmul.f32 1.442695, %v930_v46  ;;  %v941_v49 = vsub.f32 %v889_v33, %v936_v47  ;;  %v1056_v33 = vrot.slane %v2105_v28, 7 }
 0x4db   : > { %v938_v50 = vpop.permute.xlu1 %937 }
 0x4dc   : > { %1642 = vpow2.f32 %v933_v48  ;;  %v943_v51 = vmul.f32 1.442695, %v941_v49  ;;  %v942_v52 = vsub.f32 %v894_v31, %v938_v50  ;;  %v769_v31 = vlaneseq }
 0x4dd   : > { %v1256_v48 = vrot.slane %v2101_v26, 1 }
 0x4de   : > { %1644 = vpow2.f32 %v943_v51  ;;  %v945_v53 = vmul.f32 1.442695, %v942_v52  ;;  %v770_v32 = vshrl.u32 %v769_v31, 7 }
 0x4e0   : > { %1646 = vpow2.f32 %v945_v53  ;;  %vm1057_vm2 = vcmp.lt.s32.totalorder %v770_v32, 1  ;;  %vm1259_vm3 = vcmp.lt.s32.totalorder %v770_v32, 7 }
 0x4e1   : > { %1648 = vpow2.f32 %v917_v61  ;;  %v1058_v37 = vsel %vm1057_vm2, %v1055_v34, %v1056_v33  ;;  %v1059_v42 = vsel %vm1057_vm2, %v1054_v36, %v1055_v34  ;;  %v1260_v51 = vsel %vm1259_vm3, %v1257_v39, %v1258_v40 }
 0x4e2   : > { %1650 = vpow2.f32 %v919_v62 }
 0x4e4   : > { %v1641_v54 = vpop.eup %1640 }
 0x4e5   : > { %949 = vrot.lane.b32.xlu0 %v1641_v54, %s1809_s13 }
 0x4e6   : > { %v1643_v55 = vpop.eup %1642 }
 0x4e7   : > { %951 = vrot.lane.b32.xlu1 %v1643_v55, %s1809_s13 }
 0x4e8   : > { %v1645_v56 = vpop.eup %1644 }
 0x4e9   : > { %959 = vrot.lane.b32.xlu0 %v1645_v56, %s1810_s15 }
 0x4ea   : > { %v1647_v58 = vpop.eup %1646 }
 0x4eb   : > { %961 = vrot.lane.b32.xlu1 %v1647_v58, %s1810_s15  ;;  %v1649_v0 = vpop.eup %1648 }
 0x4ec   : > { %v1651_v5 = vpop.eup %1650 }
 0x557   : > { %v950_v63 = vpop.permute.xlu0 %949 }
 0x558   : > { %v955_v4 = vadd.f32 %v1649_v0, %v950_v63 }
 0x559   : > { %v952_v3 = vpop.permute.xlu1 %951 }
 0x55a   : > { %v956_v7 = vadd.f32 %v1651_v5, %v952_v3 }
 0x55b   : > { %v960_v6 = vpop.permute.xlu0 %959 }
 0x55c   : > { %v965_v8 = vadd.f32 %v960_v6, %v955_v4 }
 0x55d   : > { %v962_v9 = vpop.permute.xlu1 %961 }
 0x55e   : > { %1652 = vrcp.f32 %v965_v8  ;;  %v966_v10 = vadd.f32 %v962_v9, %v956_v7 }
 0x560   : > { %1654 = vrcp.f32 %v966_v10 }
 0x568   : > { %v1653_v11 = vpop.eup %1652 }
 0x569   : > { %1066 = vrot.lane.b32.xlu0 %v1653_v11, %s1811_s11  ;;  %v970_v12 = vmul.f32 %v1653_v11, %v1649_v0 }
 0x56a   : > { %v1655_v13 = vpop.eup %1654 }
 0x56b   : > { %1519 = vmatprep.mubr.msk.f32.mxu1 %vm972_vm1, %v970_v12  ;;  %1068 = vrot.lane.b32.xlu1 %v1655_v13, %s1811_s11  ;;  %v971_v14 = vmul.f32 %v1655_v13, %v1651_v5 }
 0x56d   : > { %1163 = vrot.lane.b32.xlu0 %v1653_v11, %s1812_s29  ;;  %1520 = vmatmul.mubr.msk.f32.vlgmr.msra.gmra.mrb[2].mxu1 %vm972_vm1, %v971_v14 }
 0x56e   : > { %1528 = vmatpush3.msra.mxu1 %v969_v57 }
 0x56f   : > { %1165 = vrot.lane.b32.xlu1 %v1655_v13, %s1812_s29 }
 0x5db   : > { %v1067_v15 = vpop.permute.xlu0 %1066 }
 0x5dc   : > { %v1072_v16 = vmul.f32 %v1641_v54, %v1067_v15  ;;  %v1261_v54 = vsel %vm1259_vm3, %v1256_v48, %v1257_v39 }
 0x5dd   : > { %v1069_v17 = vpop.permute.xlu1 %1068 }
 0x5de   : > { %v1073_v18 = vmul.f32 %v1643_v55, %v1069_v17  ;;  %1076 = vrot.lane.b32.xlu0 %v1072_v16, %s1809_s13 }
 0x5df   : > { %v1164_v19 = vpop.permute.xlu0 %1163 }
 0x5e0   : > { %v1169_v20 = vmul.f32 %v1645_v56, %v1164_v19  ;;  %1078 = vrot.lane.b32.xlu1 %v1073_v18, %s1809_s13  ;;  %s2157_s13 = scalar_lea.hbm %s2251_s26, %s1467_s1 }
 0x5e1   : > { %v1166_v21 = vpop.permute.xlu1 %1165 }
 0x5e2   : > { %v1170_v22 = vmul.f32 %v1647_v58, %v1166_v21  ;;  %1173 = vrot.lane.b32.xlu0 %v1169_v20, %s1810_s15 }
 0x5e4   : > { %1175 = vrot.lane.b32.xlu1 %v1170_v22, %s1810_s15  ;;  %s1814_s15 = smov [#allocation7]  }
 0x5e5   : > { %s1720_s29 = sshll.u32 %s1814_s15, 4  ;;  %s1721_s29 = int_to_ptr.vmem [resolvable:$false] %s1720_s29 }
 0x5e6   : > { %s1722_s14 = scalar_lea.vmem %s1721_s29, 512  ;;  %p1723_p10 = scmp.lt.s32.totalorder %s2160_s12, %s1721_s29 }
 0x5e7   : > { %p1724_p12 = scmp.lt.s32.totalorder %s1722_s14, %s1716_s27 }
 0x5e9   : > { %p1725_p9 = por %p1724_p12, %p1723_p10 }
 0x5eb   : > { %p1726_p1 = pnand %p1725_p9, %p1719_p7 }
 0x640   : > { %v1521_v23 = vpop.f32.mrb[2].mxu1 }
 0x641   : > { %v1045_v24 = vpop.f32.mrb[3].mxu1  ;;  %v1061_v41 = vmul.f32 %v1521_v23, %v1058_v37 }
 0x642   : > { %v1060_v45 = vmul.f32 %v1059_v42, %v1045_v24 }
 0x650   : > { %v1077_v25 = vpop.permute.xlu0 %1076 }
 0x651   : > { %1524 = vmatprep.mubr.msk.f32.mxu0 %vm972_vm1, %v1077_v25 }
 0x652   : > { %v1079_v27 = vpop.permute.xlu1 %1078 }
 0x653   : > { %1525 = vmatmul.mubr.msk.f32.vlgmr.msra.gmra.mrb[4].mxu0 %vm972_vm1, %v1079_v27 }
 0x654   : > { %v1174_v29 = vpop.permute.xlu0 %1173 }
 0x655   : > { %1529 = vmatprep.mubr.msk.f32.mxu1 %vm972_vm1, %v1174_v29 }
 0x656   : > { %v1176_v30 = vpop.permute.xlu1 %1175 }
 0x657   : > { %1530 = vmatmul.mubr.msk.f32.vlgmr.msra.gmra.mrb[4].mxu1 %vm972_vm1, %v1176_v30 }
 0x726   : > { %v1526_v38 = vpop.f32.mrb[4].mxu0 }
 0x727   : > { %v1160_v43 = vmul.f32 %v1526_v38, %v2105_v28  ;;  %v1150_v44 = vpop.f32.mrb[5].mxu0  ;;  %v1457_v28 = vld [vmem:[%s2222_s10] ss:$0 sm:$0xff] }
 0x728   : > { %v1159_v46 = vmul.f32 %v1150_v44, %v2101_v26 }
 0x729   : > { %v1162_v47 = vadd.f32 %v1160_v43, %v1061_v41 }
 0x72a   : > { %v1161_v49 = vadd.f32 %v1159_v46, %v1060_v45  ;;  %v1531_v50 = vpop.f32.mrb[4].mxu1 }
 0x72b   : > { %v1263_v52 = vmul.f32 %v1531_v50, %v1260_v51  ;;  %v1247_v53 = vpop.f32.mrb[5].mxu1 }
 0x72c   : > { %v1262_v55 = vmul.f32 %v1261_v54, %v1247_v53 }
 0x72d   : > { %v1265_v56 = vadd.f32 %v1263_v52, %v1162_v47 }
 0x72e   : > { %v1264_v57 = vadd.f32 %v1262_v55, %v1161_v49 }
 0x72f   : > { %v1274_v58 = vadd.f32 %v1457_v28, %v1265_v56 }
 0x730   : > { %v1273_v26 = vadd.f32 %v1457_v28, %v1264_v57 }
 0x731   : > { %v1276_v59 = vadd.f32 %v1274_v58, %v2048_v1 }
 0x732   : > { %v1275_v60 = vadd.f32 %v1273_v26, %v2050_v2 }
 0x733   : > { %1278 = vst.msk [vmem:[%s518_s17 + $0x8] sm:$0xff] %vm545_vm0, %v1276_v59 }
 0x734   : > { %1277 = vst.msk [vmem:[%s518_s17] sm:$0xff] %vm545_vm0, %v1275_v60 }
 0x735   : > { %1729 = shalt.err (!%p1726_p1)
}
 0x736   : > { %s1730_s19 = scalar_lea.hbm %s2157_s13, 256  ;;  %s1734_s1 = scalar_lea.hbm %s2251_s26, 512 }
 0x737   : > { %p1731_p6 = scmp.ne.s32.totalorder %s2157_s13, %s1730_s19  ;;  %p1735_p13 = scmp.lt.u32.totalorder %s2157_s13, %s2251_s26 }
 0x738   : > { %p1736_p8 = scmp.lt.u32.totalorder %s1734_s1, %s1730_s19  ;;  %p1738_p3 = scmp.lt.u32.totalorder %s1730_s19, %s2157_s13 }
 0x739   : > { %p1732_p2 = pnand %p1731_p6, %p2252_p11 }
 0x73a   : > { %p1737_p0 = por %p1736_p8, %p1735_p13 }
 0x73b   : > { %p1733_p5 = pneg %p1732_p2 }
 0x73c   : > { %p1739_p4 = por %p1738_p3, %p1737_p0 }
 0x73e   : > { %p1740_p7 = pnand %p1739_p4, %p1733_p5 }
 0x740   : > { %1743 = shalt.err (!%p1740_p7)
}
 0x741   : > { %s1815_s25 = smov 128  }
 0x742   : > { %1552 = dma.vmem_to_hbm [thread:$0]  (%p2252_p11), %s2160_s12, 256, %s2157_s13, %s1280_s20, %s1815_s25, %s1815_s25, %s1811_s11  }
 0x743 PF: > { %s2253_s27 = sld [smem:[#allocation11_spill]]  ;;  %s2254_s15 = sld [smem:[#allocation15_spill]] }
 0x744   : > { %p2256_p12 = scmp.ge.s32.totalorder %s1802_s22, 2 }
 0x749   : > { %s1310_s29 = sand.u32 1, %s2253_s27   ;;  %p2255_p10 = scmp.ne.s32.totalorder %s2254_s15, 0 }
 0x74a   : > { %s1311_s14 = scalar_lea.sflag [#allocation4], %s1310_s29 }
 0x74b   : > { %p1562_p9 = pnand %p2256_p12, %p2255_p10 }
 0x74d   : > { %1777 = dma.done.wait (!%p1562_p9), %s1311_s14, 256  }
 0x74e   : > { %1779 = vsyncadd (!%p1562_p9), %s1311_s14, 4294967040  ;;  %s30_s22 = sadd.s32 1, %s1802_s22   ;;  %s2257_s30 = sld [smem:[#allocation12_spill]] }
 0x74f   : > { %p27_p1 = scmp.ge.s32.totalorder %s30_s22, 4   ;;  %s2258_s19 = sld [smem:[#allocation14_spill]] }
 0x750   : > { %s2259_s23 = sld [smem:[#allocation13_spill]]  ;;  %s2260_s17 = smov %s1786_s18 }
 0x751   : > { %s2262_s20 = smov %s1798_s21  ;;  %29 = sbr.rel (!%p27_p1) target bundleno = 11 (0xb), region = 125 }
 0x754   : > { %s2261_s18 = smov %s2257_s30 }
 0x756   : > { %s2263_s21 = smov %s2259_s23 }
 0x758   :  { %1316 = vsyncpa [#allocation3], 1 }
 0x759   :  { %1318 = vsyncpa [#allocation3 + $0x1], 1 }
 0x75a   :  { %1319 = vsyncpa [#allocation6], 1 }
 0x75b   :  { %1321 = vsyncpa [#allocation6 + $0x1], 1 }
 0x75c   :  { %1322 = vsyncpa [#allocation4], 1 }
 0x75d   :  { %1324 = vsyncpa [#allocation4 + $0x1], 1 }

// kernel: tpu_custom_call.1
= control target key start
LH: loop header
LB: loop body
LE: loop exit
PB: predicated region body
PF: predicated region fallthrough
CT: control target
= control target key end

     0   :  { %s2212_s0 = inlined_call_operand.vmem [shape: f32[2,16,32], index: 0, kind: input, shape index: {}]   ;;  %s2213_s1 = inlined_call_operand.hbm [shape: f32[2,16,32], index: 1, kind: input, shape index: {}]   ;;  %s2214_s2 = inlined_call_operand.hbm [shape: f32[2,16,32], index: 2, kind: input, shape index: {}]   ;;  %s2215_s3 = inlined_call_operand.vmem [shape: f32[1,32], index: 3, kind: input, shape index: {}]   ;;  %s2216_s4 = inlined_call_operand.vmem [shape: f32[1,32], index: 4, kind: input, shape index: {}]   ;;  %s2217_s5 = inlined_call_operand.vmem [shape: f32[32,64], index: 5, kind: input, shape index: {}]   ;;  %s2218_s6 = inlined_call_operand.vmem [shape: f32[1,64], index: 6, kind: input, shape index: {}]   ;;  %s2219_s7 = inlined_call_operand.vmem [shape: f32[32,24], index: 7, kind: input, shape index: {}]   ;;  %s2220_s8 = inlined_call_operand.vmem [shape: f32[1,24], index: 8, kind: input, shape index: {}]   ;;  %s2221_s9 = inlined_call_operand.vmem [shape: f32[8,32], index: 9, kind: input, shape index: {}]   ;;  %s2222_s10 = inlined_call_operand.vmem [shape: f32[1,32], index: 10, kind: input, shape index: {}]   ;;  %s2223_s11 = inlined_call_operand.hbm [shape: f32[2,16,32], index: 11, kind: output, shape index: {}]  }
   0x1   :  { %2232 = sst [smem:[#allocation16_spill]] %s2213_s1 }
   0x2   :  { %2233 = sst [smem:[#allocation17_spill]] %s2223_s11 }
   0x3   :  { %16 = vsyncpa [#allocation3], 0 }
   0x4   :  { %18 = vsyncpa [#allocation3 + $0x1], 0 }
   0x5   :  { %19 = vsyncpa [#allocation6], 0 }
   0x6   :  { %21 = vsyncpa [#allocation6 + $0x1], 0 }
   0x7   :  { %22 = vsyncpa [#allocation4], 0 }
   0x8   :  { %24 = vsyncpa [#allocation4 + $0x1], 0  ;;  %s1876_s17 = smov 0   ;;  %s1878_s18 = smov 0  }
   0x9   :  { %s1880_s19 = smov 0   ;;  %s1882_s20 = smov 0  }
   0xa   :  { %s1884_s21 = smov 0   ;;  %s1886_s22 = smov 0  }
   0xb LB: > { %2234 = sst [smem:[#allocation11_spill]] %s1782_s17  ;;  %s1425_s23 = sadd.s32 4294967295, %s1802_s22   ;;  %s1802_s22 = sphi %s1886_s22, %s30_s22   ;;  %s1798_s21 = sphi %s1884_s21, %s2263_s21   ;;  %s1794_s20 = sphi %s1882_s20, %s2262_s20   ;;  %s1790_s19 = sphi %s1880_s19, %s2258_s19   ;;  %s1786_s18 = sphi %s1878_s18, %s2261_s18   ;;  %s1782_s17 = sphi %s1876_s17, %s2260_s17  }
   0xc   : > { %2235 = sst [smem:[#allocation12_spill]] %s1790_s19  ;;  %s1426_s24 = sadd.s32 4294967294, %s1802_s22  }
   0xd   : > { %s42_s25 = sadd.s32 1, %s1798_s21  ;;  %s87_s26 = sadd.s32 1, %s1790_s19 }
   0xe   : > { %p44_p0 = scmp.ge.s32.totalorder %s42_s25, 2  ;;  %p94_p1 = scmp.ne.s32.totalorder %s1790_s19, %s1786_s18 }
   0xf   : > { %p95_p2 = scmp.eq.s32.totalorder %s1802_s22, 0  ;;  %p100_p3 = scmp.ne.s32.totalorder %s1786_s18, %s1782_s17 }
  0x10   : > { %s2265_s25 = smov (%p44_p0, %s42_s25), 0  ;;  %p101_p5 = scmp.eq.s32.totalorder %s1425_s23, 0 }
  0x11   : > { %2236 = sst [smem:[#allocation13_spill]] %s2265_s25  ;;  %p1917_p4 = por %p95_p2, %p94_p1 }
  0x12   : > { %s82_s28 = ssub.s32 %s1798_s21, %s2265_s25  ;;  %p330_p6 = scmp.eq.s32.totalorder %s1425_s23, 1 }
  0x13   : > { %p85_p7 = scmp.eq.s32.totalorder %s82_s28, 0  ;;  %p1923_p8 = por %p101_p5, %p100_p3 }
  0x14   : > { %p1927_p9 = por %p330_p6, %p94_p1  ;;  %p336_p10 = scmp.eq.s32.totalorder %s1426_s24, 1 }
  0x15   : > { %s2238_s29 = scalar_select %p1923_p8, 1, 0 }
  0x16   : > { %s2239_s30 = scalar_select %p1927_p9, 1, 0 }
  0x17   : > { %s1932_s12 = scalar_select %p85_p7, %s1790_s19, %s87_s26  }
  0x18   : > { %p1934_p11 = por %p336_p10, %p100_p3  ;;  %p1565_p13 = scmp.lt.s32.totalorder %s1802_s22, 2 }
  0x19   : > { %2240 = sst [smem:[#allocation14_spill]] %s1932_s12  ;;  %s1941_s14 = sand.u32 1, %s1790_s19  }
  0x1a   : > { %s2241_s13 = scalar_select %p1934_p11, 1, 0 }
  0x1b   : > { %s1429_s15 = sshll.u32 %s1941_s14, 4  ;;  %s2226_s16 = sshll.u32 %s1798_s21, 8 }
  0x1c   : > { %2242 = sst [smem:[#allocation15_spill]] %s2241_s13  ;;  %s2243_s1 = sld [smem:[#allocation16_spill]] }
  0x1d   : > { %s403_s24 = scalar_lea.vmem [#allocation2], %s1429_s15  ;;  %p1956_p0 = pnand %p1565_p13, %p1917_p4 }
  0x1e   : > { %s412_s26 = sshll.u32 %s403_s24, 4  ;;  %s1952_s26 = int_to_ptr.vmem [resolvable:$true] %s412_s26 }
  0x1f   : > { %p1658_p3 = pneg %p1956_p0 }
  0x22   : > { %s1950_s25 = scalar_lea.hbm %s2243_s1, %s2226_s16  ;;  %s1661_s27 = scalar_lea.hbm %s2243_s1, 512 }
  0x23   : > { %s1656_s23 = scalar_lea.hbm %s1950_s25, 256  ;;  %p1662_p4 = scmp.lt.u32.totalorder %s1950_s25, %s2243_s1 }
  0x24   : > { %p1657_p2 = scmp.ne.s32.totalorder %s1950_s25, %s1656_s23  ;;  %p1663_p7 = scmp.lt.u32.totalorder %s1661_s27, %s1656_s23 }
  0x25   : > { %p1665_p13 = scmp.lt.u32.totalorder %s1656_s23, %s1950_s25 }
  0x26   : > { %p1659_p5 = pnand %p1658_p3, %p1657_p2  ;;  %p1664_p10 = por %p1663_p7, %p1662_p4 }
  0x28   : > { %p1660_p6 = pneg %p1659_p5  ;;  %p1666_p12 = por %p1665_p13, %p1664_p10 }
  0x2a   : > { %p1667_p1 = pnand %p1666_p12, %p1660_p6 }
  0x2c   : > { %1670 = shalt.err (!%p1667_p1)
}
  0x2d   : > { %s1671_s19 = scalar_lea.vmem %s1952_s26, 256  ;;  %s1804_s15 = smov [#allocation2]  }
  0x2e   : > { %p1672_p2 = scmp.ne.s32.totalorder %s1952_s26, %s1671_s19  ;;  %s1676_s28 = sshll.u32 %s1804_s15, 4  ;;  %s1677_s28 = int_to_ptr.vmem [resolvable:$false] %s1676_s28 }
  0x2f   : > { %s1678_s16 = scalar_lea.vmem %s1677_s28, 512  ;;  %p1679_p9 = scmp.lt.s32.totalorder %s1952_s26, %s1677_s28 }
  0x30   : > { %p1674_p5 = pnand %p1672_p2, %p1658_p3  ;;  %p1680_p4 = scmp.lt.s32.totalorder %s1678_s16, %s1671_s19 }
  0x32   : > { %p1675_p11 = pneg %p1674_p5  ;;  %p1681_p7 = por %p1680_p4, %p1679_p9 }
  0x34   : > { %p1682_p10 = pnand %p1681_p7, %p1675_p11 }
  0x36   : > { %1685 = shalt.err (!%p1682_p10)
}
  0x37   : > { %s1805_s23 = smov 128   ;;  %s1806_s27 = smov 8  }
  0x38   : > { %s2245_s24 = scalar_lea.sflag [#allocation3], %s1941_s14  ;;  %p444_p12 = scmp.lt.s32.totalorder %s1802_s22, 3 }
  0x39   : > { %1557 = dma.hbm_to_vmem [thread:$0]  (!%p1956_p0), %s1950_s25, 256, %s1952_s26, %s2245_s24, %s1805_s23, %s1805_s23, %s1806_s27  }
  0x3a   : > { %s1432_s19 = sshll.u32 %s1941_s14, 3  ;;  %s2246_s15 = sshll.u32 %s1798_s21, 8 }
  0x3b   : > { %s1465_s28 = sadd.s32 128, %s2246_s15  ;;  %p2247_p9 = scmp.ge.s32.totalorder %s1802_s22, 1 }
  0x3c   : > { %s2002_s17 = scalar_lea.hbm %s2214_s2, %s1465_s28  ;;  %s426_s11 = scalar_lea.vmem [#allocation5], %s1432_s19 }
  0x3d   : > { %p1995_p11 = pnand %p2247_p9, %p444_p12  ;;  %s439_s25 = sshll.u32 %s426_s11, 4  ;;  %s440_s25 = int_to_ptr.vmem [resolvable:$true] %s439_s25 }
  0x3e   : > { %s423_s26 = scalar_lea.sflag [#allocation6], %s1941_s14  ;;  %s1686_s23 = scalar_lea.hbm %s2002_s17, 128 }
  0x3f   : > { %s2248_s16 = scalar_select %p1995_p11, 1, 0 }
  0x40   : > { %p1687_p1 = scmp.ne.s32.totalorder %s2002_s17, %s1686_s23  ;;  %s1691_s1 = scalar_lea.hbm %s2214_s2, 512 }
  0x41   : > { %p1692_p2 = scmp.lt.u32.totalorder %s2002_s17, %s2214_s2  ;;  %p1693_p5 = scmp.lt.u32.totalorder %s1691_s1, %s1686_s23 }
  0x42   : > { %p1689_p6 = pnand %p1687_p1, %p1658_p3  ;;  %p1695_p7 = scmp.lt.u32.totalorder %s1686_s23, %s2002_s17 }
  0x43   : > { %p1694_p4 = por %p1693_p5, %p1692_p2 }
  0x44   : > { %p1690_p13 = pneg %p1689_p6 }
  0x45   : > { %p1696_p10 = por %p1695_p7, %p1694_p4 }
  0x47   : > { %p1697_p12 = pnand %p1696_p10, %p1690_p13 }
  0x49   : > { %1700 = shalt.err (!%p1697_p12)
}
  0x4a   : > { %s1701_s11 = scalar_lea.vmem %s440_s25, 128  ;;  %s1807_s14 = smov [#allocation5]  }
  0x4b   : > { %p1702_p9 = scmp.ne.s32.totalorder %s440_s25, %s1701_s11  ;;  %s1706_s19 = sshll.u32 %s1807_s14, 4  ;;  %s1707_s19 = int_to_ptr.vmem [resolvable:$false] %s1706_s19 }
  0x4c   : > { %s1708_s28 = scalar_lea.vmem %s1707_s19, 256  ;;  %p1709_p8 = scmp.lt.s32.totalorder %s440_s25, %s1707_s19 }
  0x4d   : > { %p1704_p1 = pnand %p1702_p9, %p1658_p3  ;;  %p1710_p11 = scmp.lt.s32.totalorder %s1708_s28, %s1701_s11 }
  0x4f   : > { %p1705_p6 = pneg %p1704_p1  ;;  %p1711_p2 = por %p1710_p11, %p1709_p8 }
  0x51   : > { %p1712_p5 = pnand %p1711_p2, %p1705_p6 }
  0x53   : > { %1715 = shalt.err (!%p1712_p5)
}
  0x54   : > { %1560 = dma.hbm_to_vmem [thread:$0]  (!%p1956_p0), %s2002_s17, 128, %s440_s25, %s423_s26  }
  0x55   : > { %p2249_p13 = scmp.ne.s32.totalorder %s2248_s16, 0 }
  0x56   : > { %s2027_s23 = sand.u32 (!%p2249_p13), 1, %s1786_s18   ;;  %p2250_p8 = scmp.ne.s32.totalorder (!%p2249_p13), %s2238_s29, 0 }
  0x57   : > { %448 = sbr.rel (%p2249_p13) target bundleno = 1859 (0x743), region = 64  ;;  %s1436_s27 = sshll.u32 (!%p2249_p13), %s2027_s23, 4 }
  0x58   : > { %s451_s24 = scalar_lea.sflag (!%p2249_p13), [#allocation3], %s2027_s23  ;;  %s454_s1 = scalar_lea.vmem (!%p2249_p13), [#allocation2], %s1436_s27 }
  0x5e   : > { %1769 = dma.done.wait (%p2250_p8), %s451_s24, 256  }
  0x5f   : > { %1771 = vsyncadd (%p2250_p8), %s451_s24, 4294967040  ;;  %s1437_s17 = sshll.u32 %s2027_s23, 3  ;;  %s460_s12 = scalar_lea.sflag [#allocation6], %s2027_s23 }
  0x60   : > { %s463_s16 = scalar_lea.vmem [#allocation5], %s1437_s17 }
  0x61   : > { %1773 = dma.done.wait (%p2250_p8), %s460_s12, 128  }
  0x62   : > { %1775 = vsyncadd (%p2250_p8), %s460_s12, 4294967168  ;;  %p523_p0 = scmp.lt.s32.totalorder %s1794_s20, 1  ;;  %vm545_vm0 = vcmask 261120   ;;  %v2048_v1 = vld [vmem:[%s454_s1 + $0x8] sm:$0xff]  ;;  %v2050_v2 = vld [vmem:[%s454_s1] sm:$0xff]  ;;  %s1809_s13 = smov 120  }
  0x63   : > { %v552_v4 = vsel %vm545_vm0, %v2048_v1, 0.0  ;;  %v544_v5 = vld [vmem:[%s463_s16] sm:$0xff]  ;;  %v549_v6 = vsel %vm545_vm0, %v2050_v2, 0.0  ;;  %v623_v30 = vld [vmem:[%s2217_s5 + $0x10] sm:$0xff]  ;;  %v624_v32 = vld [vmem:[%s2217_s5 + $0x18] sm:$0xff]  ;;  %s1808_s16 = smov 96  }
  0x64   : > { %s524_s25 = scalar_select %p523_p0, %s1794_s20, 1  ;;  %553 = vadd.xlane.f32.xlu1 %v552_v4  ;;  %v555_v7 = vsel %vm545_vm0, %v544_v5, 0.0  ;;  %v621_v28 = vld [vmem:[%s2217_s5] sm:$0xff]  ;;  %v622_v29 = vld [vmem:[%s2217_s5 + $0x8] sm:$0xff]  ;;  %v1536_v33 = vpack.c.bf16 %v624_v32, %v623_v30  ;;  %vm972_vm1 = vcmask 64512  }
  0x65   : > { %v1532_v31 = vpack.c.bf16 %v622_v29, %v621_v28  ;;  %v1441_v47 = vld [vmem:[%s2215_s3] ss:$0 sm:$0xff]  ;;  %s1810_s15 = smov 112   ;;  %s1812_s29 = smov 16  }
  0x66   : > { %s1466_s26 = sshll.u32 %s524_s25, 4  ;;  %v1442_v49 = vld [vmem:[%s2216_s4] ss:$0 sm:$0xff]  ;;  %s1467_s1 = sshll.u32 %s1794_s20, 8 }
  0x67   : > { %s530_s11 = scalar_lea.vmem %s2212_s0, %s1466_s26  ;;  %1533 = vmatprep.subr.bf16.mxu0 %v1532_v31  ;;  %v1448_v29 = vld [vmem:[%s2220_s8] ss:$0 sm:$0xff]  ;;  %s518_s17 = scalar_lea.vmem [#allocation7], %s1436_s27 }
  0x68   : > { %v543_v0 = vld [vmem:[%s530_s11] sm:$0xff]  ;;  %556 = vadd.xlane.f32.xlu1 %v555_v7  ;;  %1535 = vmatpush3.bf16.msra.mxu0 %v1532_v31  ;;  %s1811_s11 = smov 8   ;;  %s1295_s12 = sshll.u32 %s518_s17, 4  ;;  %s2160_s12 = int_to_ptr.vmem [resolvable:$true] %s1295_s12 }
  0x69   : > { %v546_v3 = vsel %vm545_vm0, %v543_v0, 0.0  ;;  %1537 = vmatprep.subr.bf16.mxu0 %v1536_v33  ;;  %s2251_s26 = sld [smem:[#allocation17_spill]]  ;;  %s1280_s20 = scalar_lea.sflag [#allocation4], %s2027_s23 }
  0x6a   : > { %547 = vadd.xlane.f32.xlu0 %v546_v3  ;;  %v806_v3 = vld [vmem:[%s2219_s7 + $0x8] sm:$0xff]  ;;  %s1716_s27 = scalar_lea.vmem %s2160_s12, 256  ;;  %p2252_p11 = scmp.ne.s32.totalorder %s2239_s30, 0 }
  0x6b   : > { %p1717_p3 = scmp.ne.s32.totalorder %s2160_s12, %s1716_s27 }
  0x6c   : > { %1539 = vmatpush3.bf16.msra.mxu0 %v1536_v33 }
  0x6d   : > { %p1718_p4 = pnand %p1717_p3, %p2252_p11 }
  0x6e   : > { %550 = vadd.xlane.f32.xlu0 %v549_v6 }
  0x6f   : > { %p1719_p7 = pneg %p1718_p4 }
  0xf1   : > { %v554_v9 = vpop.xlane.xlu1 %553 }
  0xf2   : > { %v561_v11 = vmul.f32 0.03125, %v554_v9 }
  0xf4   : > { %v565_v13 = vsub.f32 %v2048_v1, %v561_v11 }
  0xf5   : > { %v557_v15 = vpop.xlane.xlu1 %556 }
  0xf6   : > { %v562_v17 = vmul.f32 0.03125, %v557_v15  ;;  %v569_v19 = vmul.f32 %v565_v13, %v565_v13 }
  0xf7   : > { %v548_v8 = vpop.xlane.xlu0 %547 }
  0xf8   : > { %v559_v10 = vmul.f32 0.03125, %v548_v8  ;;  %v566_v21 = vsub.f32 %v544_v5, %v562_v17  ;;  %v577_v23 = vsel %vm545_vm0, %v569_v19, 0.0  ;;  %v1443_v5 = vld [vmem:[%s2218_s6] ss:$0 sm:$0xff]  ;;  %v808_v19 = vld [vmem:[%s2219_s7 + $0x18] sm:$0xff] }
  0xfa   : > { %v563_v12 = vsub.f32 %v543_v0, %v559_v10  ;;  %v570_v25 = vmul.f32 %v566_v21, %v566_v21  ;;  %v805_v0 = vld [vmem:[%s2219_s7] sm:$0xff] }
  0xfb   : > { %v551_v14 = vpop.xlane.xlu0 %550  ;;  %v1540_v4 = vpack.c.bf16 %v806_v3, %v805_v0 }
  0xfc   : > { %v560_v16 = vmul.f32 0.03125, %v551_v14  ;;  %v567_v18 = vmul.f32 %v563_v12, %v563_v12  ;;  %v580_v27 = vsel %vm545_vm0, %v570_v25, 0.0 }
  0xfd   : > { %1541 = vmatprep.subr.bf16.mxu1 %v1540_v4 }
  0xfe   : > { %v564_v20 = vsub.f32 %v2050_v2, %v560_v16  ;;  %v571_v22 = vsel %vm545_vm0, %v567_v18, 0.0  ;;  %1543 = vmatpush3.bf16.msra.mxu1 %v1540_v4  ;;  %v807_v18 = vld [vmem:[%s2219_s7 + $0x10] sm:$0xff] }
  0xff   : > { %572 = vadd.xlane.f32.xlu0 %v571_v22 }
 0x100   : > { %v568_v24 = vmul.f32 %v564_v20, %v564_v20 }
 0x102   : > { %v574_v26 = vsel %vm545_vm0, %v568_v24, 0.0 }
 0x103   : > { %578 = vadd.xlane.f32.xlu0 %v577_v23  ;;  %575 = vadd.xlane.f32.xlu1 %v574_v26 }
 0x107   : > { %581 = vadd.xlane.f32.xlu1 %v580_v27 }
 0x18c   : > { %v573_v34 = vpop.xlane.xlu0 %572 }
 0x18d   : > { %v583_v35 = vmul.f32 0.03125, %v573_v34 }
 0x18f   : > { %v587_v36 = vadd.f32 1e-05, %v583_v35 }
 0x190   : > { %v576_v37 = vpop.xlane.xlu1 %575  ;;  %v579_v38 = vpop.xlane.xlu0 %578 }
 0x191   : > { %1624 = vrsqrt.f32 %v587_v36  ;;  %v584_v39 = vmul.f32 0.03125, %v576_v37  ;;  %v585_v40 = vmul.f32 0.03125, %v579_v38 }
 0x193   : > { %v588_v41 = vadd.f32 1e-05, %v584_v39  ;;  %v589_v42 = vadd.f32 1e-05, %v585_v40 }
 0x194   : > { %v582_v43 = vpop.xlane.xlu1 %581 }
 0x195   : > { %1626 = vrsqrt.f32 %v588_v41  ;;  %v586_v44 = vmul.f32 0.03125, %v582_v43 }
 0x196   : > { %1628 = vrsqrt.f32 %v589_v42 }
 0x197   : > { %v590_v45 = vadd.f32 1e-05, %v586_v44 }
 0x199   : > { %1630 = vrsqrt.f32 %v590_v45 }
 0x19b   : > { %v1625_v46 = vpop.eup %1624 }
 0x19c   : > { %v595_v48 = vmul.f32 %v1625_v46, %v563_v12 }
 0x19e   : > { %v606_v50 = vmul.f32 %v1441_v47, %v595_v48 }
 0x19f   : > { %v1627_v51 = vpop.eup %1626 }
 0x1a0   : > { %v1629_v52 = vpop.eup %1628  ;;  %v617_v53 = vadd.f32 %v1442_v49, %v606_v50  ;;  %v596_v54 = vmul.f32 %v1627_v51, %v564_v20  ;;  %v1544_v20 = vpack.c.bf16 %v808_v19, %v807_v18 }
 0x1a1   : > { %v597_v55 = vmul.f32 %v1629_v52, %v565_v13 }
 0x1a2   : > { %1500 = vmatprep.mubr.msk.f32.mxu0 %vm545_vm0, %v617_v53  ;;  %v607_v56 = vmul.f32 %v1441_v47, %v596_v54  ;;  %1545 = vmatprep.subr.bf16.mxu1 %v1544_v20 }
 0x1a3   : > { %v1631_v57 = vpop.eup %1630  ;;  %v608_v58 = vmul.f32 %v1441_v47, %v597_v55  ;;  %1547 = vmatpush3.bf16.msra.mxu1 %v1544_v20 }
 0x1a4   : > { %v618_v59 = vadd.f32 %v1442_v49, %v607_v56  ;;  %v598_v60 = vmul.f32 %v1631_v57, %v566_v21  ;;  %v969_v57 = vld [vmem:[%s2221_s9] sm:$0xff] }
 0x1a5   : > { %v619_v61 = vadd.f32 %v1442_v49, %v608_v58  ;;  %1517 = vmatprep.subr.mxu1 %v969_v57  ;;  %1522 = vmatprep.subr.mxu0 %v969_v57 }
 0x1a6   : > { %1501 = vmatmul.mubr.msk.f32.vlgmr.msra.gmra.mrb[0].mxu0 %vm545_vm0, %v618_v59  ;;  %v609_v62 = vmul.f32 %v1441_v47, %v598_v60 }
 0x1a7   : > { %1503 = vmatprep.mubr.msk.f32.mxu0 %vm545_vm0, %v619_v61  ;;  %1523 = vmatpush3.msra.mxu0 %v969_v57 }
 0x1a8   : > { %v620_v63 = vadd.f32 %v1442_v49, %v609_v62 }
 0x1aa   : > { %1504 = vmatmul.mubr.msk.f32.gmra.mrb[2].mxu0 %vm545_vm0, %v620_v63 }
 0x279   : > { %v1502_v6 = vpop.f32.mrb[0].mxu0 }
 0x27a   : > { %v716_v7 = vadd.f32 %v1502_v6, %v1443_v5  ;;  %v710_v8 = vpop.f32.mrb[1].mxu0 }
 0x27c   : > { %v730_v9 = vsub.f32 0.0, %v716_v7 }
 0x27d   : > { %v1505_v10 = vpop.f32.mrb[2].mxu0 }
 0x27e   : > { %v735_v11 = vmul.f32 1.442695, %v730_v9  ;;  %v720_v12 = vpop.f32.mrb[3].mxu0 }
 0x27f   : > { %v721_v13 = vadd.f32 %v1443_v5, %v720_v12 }
 0x280   : > { %1632 = vpow2.f32 %v735_v11 }
 0x281   : > { %v731_v14 = vsub.f32 0.0, %v721_v13 }
 0x283   : > { %v737_v15 = vmul.f32 1.442695, %v731_v14 }
 0x285   : > { %1634 = vpow2.f32 %v737_v15 }
 0x28a   : > { %v1633_v16 = vpop.eup %1632 }
 0x28b   : > { %v742_v17 = vadd.f32 1.0, %v1633_v16 }
 0x28d   : > { %1636 = vrcp.f32 %v742_v17 }
 0x28f   : > { %v1635_v21 = vpop.eup %1634 }
 0x290   : > { %v743_v22 = vadd.f32 1.0, %v1635_v21 }
 0x292   : > { %1638 = vrcp.f32 %v743_v22 }
 0x297   : > { %v1637_v23 = vpop.eup %1636 }
 0x298   : > { %755 = vrot.lane.b32.xlu0 %v1637_v23, %s1808_s16 }
 0x29c   : > { %v1639_v24 = vpop.eup %1638 }
 0x29d   : > { %757 = vrot.lane.b32.xlu1 %v1639_v24, %s1808_s16 }
 0x30a   : > { %v756_v25 = vpop.permute.xlu0 %755 }
 0x30b   : > { %v2101_v26 = vmul.f32 %v756_v25, %v716_v7 }
 0x30d   : > { %1514 = vmatprep.mubr.msk.f32.mxu1 %vm545_vm0, %v2101_v26 }
 0x30f   : > { %v758_v27 = vpop.permute.xlu1 %757 }
 0x310   : > { %v2105_v28 = vmul.f32 %v758_v27, %v721_v13 }
 0x312   : > { %1515 = vmatmul.mubr.msk.f32.vlgmr.msra.gmra.mrb[0].mxu1 %vm545_vm0, %v2105_v28 }
 0x313   : > { %1518 = vmatpush3.msra.mxu1 %v969_v57 }
 0x314   : > { %1527 = vmatprep.subr.mxu1 %v969_v57 }
 0x3e5   : > { %v1516_v30 = vpop.f32.mrb[0].mxu1 }
 0x3e6   : > { %v894_v31 = vadd.f32 %v1516_v30, %v1448_v29  ;;  %v888_v32 = vpop.f32.mrb[1].mxu1 }
 0x3e7   : > { %v889_v33 = vadd.f32 %v1448_v29, %v888_v32 }
 0x3e8   : > { %901 = vrot.lane.b32.xlu1 %v894_v31, %s1809_s13 }
 0x3e9   : > { %907 = vrot.lane.b32.xlu0 %v889_v33, %s1810_s15 }
 0x3ec   : > { %899 = vrot.lane.b32.xlu1 %v889_v33, %s1809_s13 }
 0x3f0   : > { %909 = vrot.lane.b32.xlu1 %v894_v31, %s1810_s15 }
 0x45a   : > { %v902_v34 = vpop.permute.xlu1 %901 }
 0x45b   : > { %v908_v37 = vpop.permute.xlu0 %907  ;;  %v906_v38 = vmax.f32 %v894_v31, %v902_v34  ;;  %v1055_v34 = vrot.slane %v2101_v26, 7 }
 0x45e   : > { %v900_v35 = vpop.permute.xlu1 %899 }
 0x45f   : > { %v905_v36 = vmax.f32 %v889_v33, %v900_v35  ;;  %v1813_v35 = vmov 0.0  }
 0x461   : > { %v913_v39 = vmax.f32 %v905_v36, %v908_v37  ;;  %v1054_v36 = vrot.slane %v1813_v35, 7 }
 0x462   : > { %v910_v40 = vpop.permute.xlu1 %909 }
 0x463   : > { %v914_v41 = vmax.f32 %v906_v38, %v910_v40  ;;  %923 = vrot.lane.b32.xlu0 %v913_v39, %s1811_s11  ;;  %v915_v59 = vsub.f32 %v889_v33, %v913_v39  ;;  %v1258_v40 = vrot.slane %v1813_v35, 1 }
 0x465   : > { %925 = vrot.lane.b32.xlu1 %v914_v41, %s1811_s11  ;;  %v916_v60 = vsub.f32 %v894_v31, %v914_v41  ;;  %v917_v61 = vmul.f32 1.442695, %v915_v59 }
 0x467   : > { %935 = vrot.lane.b32.xlu0 %v913_v39, %s1812_s29  ;;  %v919_v62 = vmul.f32 1.442695, %v916_v60  ;;  %v1257_v39 = vrot.slane %v2105_v28, 1 }
 0x469   : > { %937 = vrot.lane.b32.xlu1 %v914_v41, %s1812_s29 }
 0x4d5   : > { %v924_v42 = vpop.permute.xlu0 %923 }
 0x4d6   : > { %v929_v43 = vsub.f32 %v889_v33, %v924_v42 }
 0x4d7   : > { %v926_v44 = vpop.permute.xlu1 %925 }
 0x4d8   : > { %v931_v45 = vmul.f32 1.442695, %v929_v43  ;;  %v930_v46 = vsub.f32 %v894_v31, %v926_v44 }
 0x4d9   : > { %v936_v47 = vpop.permute.xlu0 %935 }
 0x4da   : > { %1640 = vpow2.f32 %v931_v45  ;;  %v933_v48 = vmul.f32 1.442695, %v930_v46  ;;  %v941_v49 = vsub.f32 %v889_v33, %v936_v47  ;;  %v1056_v33 = vrot.slane %v2105_v28, 7 }
 0x4db   : > { %v938_v50 = vpop.permute.xlu1 %937 }
 0x4dc   : > { %1642 = vpow2.f32 %v933_v48  ;;  %v943_v51 = vmul.f32 1.442695, %v941_v49  ;;  %v942_v52 = vsub.f32 %v894_v31, %v938_v50  ;;  %v769_v31 = vlaneseq }
 0x4dd   : > { %v1256_v48 = vrot.slane %v2101_v26, 1 }
 0x4de   : > { %1644 = vpow2.f32 %v943_v51  ;;  %v945_v53 = vmul.f32 1.442695, %v942_v52  ;;  %v770_v32 = vshrl.u32 %v769_v31, 7 }
 0x4e0   : > { %1646 = vpow2.f32 %v945_v53  ;;  %vm1057_vm2 = vcmp.lt.s32.totalorder %v770_v32, 1  ;;  %vm1259_vm3 = vcmp.lt.s32.totalorder %v770_v32, 7 }
 0x4e1   : > { %1648 = vpow2.f32 %v917_v61  ;;  %v1058_v37 = vsel %vm1057_vm2, %v1055_v34, %v1056_v33  ;;  %v1059_v42 = vsel %vm1057_vm2, %v1054_v36, %v1055_v34  ;;  %v1260_v51 = vsel %vm1259_vm3, %v1257_v39, %v1258_v40 }
 0x4e2   : > { %1650 = vpow2.f32 %v919_v62 }
 0x4e4   : > { %v1641_v54 = vpop.eup %1640 }
 0x4e5   : > { %949 = vrot.lane.b32.xlu0 %v1641_v54, %s1809_s13 }
 0x4e6   : > { %v1643_v55 = vpop.eup %1642 }
 0x4e7   : > { %951 = vrot.lane.b32.xlu1 %v1643_v55, %s1809_s13 }
 0x4e8   : > { %v1645_v56 = vpop.eup %1644 }
 0x4e9   : > { %959 = vrot.lane.b32.xlu0 %v1645_v56, %s1810_s15 }
 0x4ea   : > { %v1647_v58 = vpop.eup %1646 }
 0x4eb   : > { %961 = vrot.lane.b32.xlu1 %v1647_v58, %s1810_s15  ;;  %v1649_v0 = vpop.eup %1648 }
 0x4ec   : > { %v1651_v5 = vpop.eup %1650 }
 0x557   : > { %v950_v63 = vpop.permute.xlu0 %949 }
 0x558   : > { %v955_v4 = vadd.f32 %v1649_v0, %v950_v63 }
 0x559   : > { %v952_v3 = vpop.permute.xlu1 %951 }
 0x55a   : > { %v956_v7 = vadd.f32 %v1651_v5, %v952_v3 }
 0x55b   : > { %v960_v6 = vpop.permute.xlu0 %959 }
 0x55c   : > { %v965_v8 = vadd.f32 %v960_v6, %v955_v4 }
 0x55d   : > { %v962_v9 = vpop.permute.xlu1 %961 }
 0x55e   : > { %1652 = vrcp.f32 %v965_v8  ;;  %v966_v10 = vadd.f32 %v962_v9, %v956_v7 }
 0x560   : > { %1654 = vrcp.f32 %v966_v10 }
 0x568   : > { %v1653_v11 = vpop.eup %1652 }
 0x569   : > { %1066 = vrot.lane.b32.xlu0 %v1653_v11, %s1811_s11  ;;  %v970_v12 = vmul.f32 %v1653_v11, %v1649_v0 }
 0x56a   : > { %v1655_v13 = vpop.eup %1654 }
 0x56b   : > { %1519 = vmatprep.mubr.msk.f32.mxu1 %vm972_vm1, %v970_v12  ;;  %1068 = vrot.lane.b32.xlu1 %v1655_v13, %s1811_s11  ;;  %v971_v14 = vmul.f32 %v1655_v13, %v1651_v5 }
 0x56d   : > { %1163 = vrot.lane.b32.xlu0 %v1653_v11, %s1812_s29  ;;  %1520 = vmatmul.mubr.msk.f32.vlgmr.msra.gmra.mrb[2].mxu1 %vm972_vm1, %v971_v14 }
 0x56e   : > { %1528 = vmatpush3.msra.mxu1 %v969_v57 }
 0x56f   : > { %1165 = vrot.lane.b32.xlu1 %v1655_v13, %s1812_s29 }
 0x5db   : > { %v1067_v15 = vpop.permute.xlu0 %1066 }
 0x5dc   : > { %v1072_v16 = vmul.f32 %v1641_v54, %v1067_v15  ;;  %v1261_v54 = vsel %vm1259_vm3, %v1256_v48, %v1257_v39 }
 0x5dd   : > { %v1069_v17 = vpop.permute.xlu1 %1068 }
 0x5de   : > { %v1073_v18 = vmul.f32 %v1643_v55, %v1069_v17  ;;  %1076 = vrot.lane.b32.xlu0 %v1072_v16, %s1809_s13 }
 0x5df   : > { %v1164_v19 = vpop.permute.xlu0 %1163 }
 0x5e0   : > { %v1169_v20 = vmul.f32 %v1645_v56, %v1164_v19  ;;  %1078 = vrot.lane.b32.xlu1 %v1073_v18, %s1809_s13  ;;  %s2157_s13 = scalar_lea.hbm %s2251_s26, %s1467_s1 }
 0x5e1   : > { %v1166_v21 = vpop.permute.xlu1 %1165 }
 0x5e2   : > { %v1170_v22 = vmul.f32 %v1647_v58, %v1166_v21  ;;  %1173 = vrot.lane.b32.xlu0 %v1169_v20, %s1810_s15 }
 0x5e4   : > { %1175 = vrot.lane.b32.xlu1 %v1170_v22, %s1810_s15  ;;  %s1814_s15 = smov [#allocation7]  }
 0x5e5   : > { %s1720_s29 = sshll.u32 %s1814_s15, 4  ;;  %s1721_s29 = int_to_ptr.vmem [resolvable:$false] %s1720_s29 }
 0x5e6   : > { %s1722_s14 = scalar_lea.vmem %s1721_s29, 512  ;;  %p1723_p10 = scmp.lt.s32.totalorder %s2160_s12, %s1721_s29 }
 0x5e7   : > { %p1724_p12 = scmp.lt.s32.totalorder %s1722_s14, %s1716_s27 }
 0x5e9   : > { %p1725_p9 = por %p1724_p12, %p1723_p10 }
 0x5eb   : > { %p1726_p1 = pnand %p1725_p9, %p1719_p7 }
 0x640   : > { %v1521_v23 = vpop.f32.mrb[2].mxu1 }
 0x641   : > { %v1045_v24 = vpop.f32.mrb[3].mxu1  ;;  %v1061_v41 = vmul.f32 %v1521_v23, %v1058_v37 }
 0x642   : > { %v1060_v45 = vmul.f32 %v1059_v42, %v1045_v24 }
 0x650   : > { %v1077_v25 = vpop.permute.xlu0 %1076 }
 0x651   : > { %1524 = vmatprep.mubr.msk.f32.mxu0 %vm972_vm1, %v1077_v25 }
 0x652   : > { %v1079_v27 = vpop.permute.xlu1 %1078 }
 0x653   : > { %1525 = vmatmul.mubr.msk.f32.vlgmr.msra.gmra.mrb[4].mxu0 %vm972_vm1, %v1079_v27 }
 0x654   : > { %v1174_v29 = vpop.permute.xlu0 %1173 }
 0x655   : > { %1529 = vmatprep.mubr.msk.f32.mxu1 %vm972_vm1, %v1174_v29 }
 0x656   : > { %v1176_v30 = vpop.permute.xlu1 %1175 }
 0x657   : > { %1530 = vmatmul.mubr.msk.f32.vlgmr.msra.gmra.mrb[4].mxu1 %vm972_vm1, %v1176_v30 }
 0x726   : > { %v1526_v38 = vpop.f32.mrb[4].mxu0 }
 0x727   : > { %v1160_v43 = vmul.f32 %v1526_v38, %v2105_v28  ;;  %v1150_v44 = vpop.f32.mrb[5].mxu0  ;;  %v1457_v28 = vld [vmem:[%s2222_s10] ss:$0 sm:$0xff] }
 0x728   : > { %v1159_v46 = vmul.f32 %v1150_v44, %v2101_v26 }
 0x729   : > { %v1162_v47 = vadd.f32 %v1160_v43, %v1061_v41 }
 0x72a   : > { %v1161_v49 = vadd.f32 %v1159_v46, %v1060_v45  ;;  %v1531_v50 = vpop.f32.mrb[4].mxu1 }
 0x72b   : > { %v1263_v52 = vmul.f32 %v1531_v50, %v1260_v51  ;;  %v1247_v53 = vpop.f32.mrb[5].mxu1 }
 0x72c   : > { %v1262_v55 = vmul.f32 %v1261_v54, %v1247_v53 }
 0x72d   : > { %v1265_v56 = vadd.f32 %v1263_v52, %v1162_v47 }
 0x72e   : > { %v1264_v57 = vadd.f32 %v1262_v55, %v1161_v49 }
 0x72f   : > { %v1274_v58 = vadd.f32 %v1457_v28, %v1265_v56 }
 0x730   : > { %v1273_v26 = vadd.f32 %v1457_v28, %v1264_v57 }
 0x731   : > { %v1276_v59 = vadd.f32 %v1274_v58, %v2048_v1 }
 0x732   : > { %v1275_v60 = vadd.f32 %v1273_v26, %v2050_v2 }
 0x733   : > { %1278 = vst.msk [vmem:[%s518_s17 + $0x8] sm:$0xff] %vm545_vm0, %v1276_v59 }
 0x734   : > { %1277 = vst.msk [vmem:[%s518_s17] sm:$0xff] %vm545_vm0, %v1275_v60 }
 0x735   : > { %1729 = shalt.err (!%p1726_p1)
}
 0x736   : > { %s1730_s19 = scalar_lea.hbm %s2157_s13, 256  ;;  %s1734_s1 = scalar_lea.hbm %s2251_s26, 512 }
 0x737   : > { %p1731_p6 = scmp.ne.s32.totalorder %s2157_s13, %s1730_s19  ;;  %p1735_p13 = scmp.lt.u32.totalorder %s2157_s13, %s2251_s26 }
 0x738   : > { %p1736_p8 = scmp.lt.u32.totalorder %s1734_s1, %s1730_s19  ;;  %p1738_p3 = scmp.lt.u32.totalorder %s1730_s19, %s2157_s13 }
 0x739   : > { %p1732_p2 = pnand %p1731_p6, %p2252_p11 }
 0x73a   : > { %p1737_p0 = por %p1736_p8, %p1735_p13 }
 0x73b   : > { %p1733_p5 = pneg %p1732_p2 }
 0x73c   : > { %p1739_p4 = por %p1738_p3, %p1737_p0 }
 0x73e   : > { %p1740_p7 = pnand %p1739_p4, %p1733_p5 }
 0x740   : > { %1743 = shalt.err (!%p1740_p7)
}
 0x741   : > { %s1815_s25 = smov 128  }
 0x742   : > { %1552 = dma.vmem_to_hbm [thread:$0]  (%p2252_p11), %s2160_s12, 256, %s2157_s13, %s1280_s20, %s1815_s25, %s1815_s25, %s1811_s11  }
 0x743 PF: > { %s2253_s27 = sld [smem:[#allocation11_spill]]  ;;  %s2254_s15 = sld [smem:[#allocation15_spill]] }
 0x744   : > { %p2256_p12 = scmp.ge.s32.totalorder %s1802_s22, 2 }
 0x749   : > { %s1310_s29 = sand.u32 1, %s2253_s27   ;;  %p2255_p10 = scmp.ne.s32.totalorder %s2254_s15, 0 }
 0x74a   : > { %s1311_s14 = scalar_lea.sflag [#allocation4], %s1310_s29 }
 0x74b   : > { %p1562_p9 = pnand %p2256_p12, %p2255_p10 }
 0x74d   : > { %1777 = dma.done.wait (!%p1562_p9), %s1311_s14, 256  }
 0x74e   : > { %1779 = vsyncadd (!%p1562_p9), %s1311_s14, 4294967040  ;;  %s30_s22 = sadd.s32 1, %s1802_s22   ;;  %s2257_s30 = sld [smem:[#allocation12_spill]] }
 0x74f   : > { %p27_p1 = scmp.ge.s32.totalorder %s30_s22, 4   ;;  %s2258_s19 = sld [smem:[#allocation14_spill]] }
 0x750   : > { %s2259_s23 = sld [smem:[#allocation13_spill]]  ;;  %s2260_s17 = smov %s1786_s18 }
 0x751   : > { %s2262_s20 = smov %s1798_s21  ;;  %29 = sbr.rel (!%p27_p1) target bundleno = 11 (0xb), region = 125 }
 0x754   : > { %s2261_s18 = smov %s2257_s30 }
 0x756   : > { %s2263_s21 = smov %s2259_s23 }
 0x758   :  { %1316 = vsyncpa [#allocation3], 1 }
 0x759   :  { %1318 = vsyncpa [#allocation3 + $0x1], 1 }
 0x75a   :  { %1319 = vsyncpa [#allocation6], 1 }
 0x75b   :  { %1321 = vsyncpa [#allocation6 + $0x1], 1 }
 0x75c   :  { %1322 = vsyncpa [#allocation4], 1 }
 0x75d   :  { %1324 = vsyncpa [#allocation4 + $0x1], 1 }

</bundles_post_ra>
